<compile_context>
chip_gen: v7x
topology: tpu7x:2x2x1
jax: 0.10.0
libtpu: 0.0.40
codegen_flags: <defaults>
</compile_context>

<pallas_src>
import functools

import jax
import jax.numpy as jnp
from jax.experimental import pallas as pl
from jax.experimental.pallas import tpu as pltpu


def _round_up(x, m):
    return (x + m - 1) // m * m


def _fused_gnn_kernel(adj_ref, x_ref, w_ref, b_ref, out_ref, *,
                      num_layers, hidden, w_offsets, in_dims):
    """All GIN layers fused; running h stays in VMEM (bf16) across layers."""
    h = x_ref[...]                                         # bf16 (n_pad, in0_pad)
    for i in range(num_layers):
        din = in_dims[i]
        o1, o2 = w_offsets[2 * i], w_offsets[2 * i + 1]
        w1 = w_ref[o1:o1 + din, :]                         # bf16 (din, hidden)
        w2 = w_ref[o2:o2 + hidden, :]                      # bf16 (hidden, hidden)
        b1 = b_ref[2 * i:2 * i + 1, :]                     # f32  (1, hidden)
        b2 = b_ref[2 * i + 1:2 * i + 2, :]                 # f32  (1, hidden)

        # GIN aggregation: (A + (1+eps) I) @ h  — bf16 MXU pass, f32 accumulate.
        agg = jnp.dot(adj_ref[...], h, preferred_element_type=jnp.float32)

        # MLP: Linear -> ReLU -> Linear (second Linear has eval-BN folded in).
        z = jnp.dot(agg.astype(jnp.bfloat16), w1,
                    preferred_element_type=jnp.float32) + b1
        z = jnp.maximum(z, 0.0)
        z = jnp.dot(z.astype(jnp.bfloat16), w2,
                    preferred_element_type=jnp.float32) + b2
        if i != num_layers - 1:
            z = jnp.maximum(z, 0.0)        # F.relu; dropout = identity (eval)

        # Write this layer's slice of the concatenated output (whole padded
        # block is stored to HBM lane-dense once at the end of the call).
        out_ref[:, i * hidden:(i + 1) * hidden] = z
        h = z.astype(jnp.bfloat16)         # stays on-chip for the next layer

    pad = out_ref.shape[1] - num_layers * hidden
    if pad:
        out_ref[:, num_layers * hidden:] = jnp.zeros(
            (out_ref.shape[0], pad), jnp.float32)


def gnn_forward_pallas(adj, x, w_packed, b_packed, *, hidden, num_layers,
                       w_offsets, in_dims):
    """Single fused pallas_call for the whole GIN stack (small-graph dense path)."""
    n_pad = x.shape[0]
    out_w = _round_up(num_layers * hidden, 128)      # lane-dense output width

    # Advisory cost estimate (bf16 inputs, f32 biases/output).
    flops = 0
    for i in range(num_layers):
        din = in_dims[i]
        flops += 2 * n_pad * n_pad * din             # adjacency aggregation
        flops += 2 * n_pad * din * hidden            # first Linear
        flops += 2 * n_pad * hidden * hidden         # second Linear (BN folded)
    bytes_accessed = (adj.size * 2 + x.size * 2 + w_packed.size * 2
                      + b_packed.size * 4 + n_pad * out_w * 4)
    cost = pl.CostEstimate(flops=int(flops), transcendentals=0,
                           bytes_accessed=int(bytes_accessed))

    kernel = functools.partial(_fused_gnn_kernel, num_layers=num_layers,
                               hidden=hidden, w_offsets=tuple(w_offsets),
                               in_dims=tuple(in_dims))

    def run(single_buffer):
        idx2 = lambda i: (0, 0)
        if single_buffer:
            # grid=(1,) -> inputs are single-shot; no point double-buffering the
            # dominant N x N adjacency or the packed weight slab.
            adj_spec = pl.BlockSpec(adj.shape, idx2, pipeline_mode=pl.Buffered(1))
            w_spec = pl.BlockSpec(w_packed.shape, idx2,
                                  pipeline_mode=pl.Buffered(1))
        else:
            adj_spec = pl.BlockSpec(adj.shape, idx2)
            w_spec = pl.BlockSpec(w_packed.shape, idx2)
        in_specs = [adj_spec,
                    pl.BlockSpec(x.shape, idx2),
                    w_spec,
                    pl.BlockSpec(b_packed.shape, idx2)]
        out_spec = pl.BlockSpec((n_pad, out_w), idx2)

        # Explicit VMEM budget from the actual footprint (scoped default is only
        # 16 MiB on v5e / 32 MiB on v6e-v7x); capped at v7x's 64 MiB physical.
        bufs = 1 if single_buffer else 2
        footprint = (bufs * adj.size * 2 + 2 * x.size * 2
                     + bufs * w_packed.size * 2 + 2 * b_packed.size * 4
                     + 2 * n_pad * out_w * 4)
        vmem_limit = min(max(2 * footprint + (8 << 20), 16 << 20), 64 << 20)

        return pl.pallas_call(
            kernel,
            grid=(1,),
            in_specs=in_specs,
            out_specs=out_spec,
            out_shape=jax.ShapeDtypeStruct((n_pad, out_w), jnp.float32),
            compiler_params=pltpu.CompilerParams(
                dimension_semantics=("arbitrary",),
                vmem_limit_bytes=int(vmem_limit)),
            cost_estimate=cost,
        )(adj, x, w_packed, b_packed)

    try:
        out = jax.block_until_ready(run(True))
    except Exception:
        # Fallback if this jax version rejects pipeline_mode=pl.Buffered(1).
        out = run(False)
    return out[:, :num_layers * hidden]


class GNNLearnerPallas:
    """JAX/Pallas re-implementation of the PyTorch GNN_learner module (eval)."""

    def __init__(self, num_gc_layers, isize, hidden_dim, drop_ratio, key,
                 bn_eps=1e-5):
        self.num_gc_layers = num_gc_layers
        self.hidden_dim = hidden_dim
        self.drop_ratio = drop_ratio          # unused in eval mode
        self.gin_eps = 0.0                    # GINConv default eps
        self.isize = isize
        self.in0_pad = _round_up(isize, 8)
        hid_pad = _round_up(hidden_dim, 8)

        w_blocks, b_rows, offsets, in_dims = [], [], [], []
        off = 0
        for i in range(num_gc_layers):
            in_dim = hidden_dim if i else isize
            in_pad = hid_pad if i else self.in0_pad
            key, k1, k2, k3, k4 = jax.random.split(key, 5)
            lim1 = 1.0 / float(in_dim) ** 0.5
            lim2 = 1.0 / float(hidden_dim) ** 0.5
            # Linear weights pre-transposed to [in, out] so the kernel does x@W.
            w1 = jax.random.uniform(k1, (in_dim, hidden_dim), jnp.float32,
                                    -lim1, lim1)
            b1 = jax.random.uniform(k2, (1, hidden_dim), jnp.float32,
                                    -lim1, lim1)
            w2 = jax.random.uniform(k3, (hidden_dim, hidden_dim), jnp.float32,
                                    -lim2, lim2)
            b2 = jax.random.uniform(k4, (1, hidden_dim), jnp.float32,
                                    -lim2, lim2)
            # BatchNorm1d fresh-module eval constants folded into the 2nd Linear.
            gamma = jnp.ones((1, hidden_dim), jnp.float32)
            beta = jnp.zeros((1, hidden_dim), jnp.float32)
            mean = jnp.zeros((1, hidden_dim), jnp.float32)
            var = jnp.ones((1, hidden_dim), jnp.float32)
            scale = gamma * jax.lax.rsqrt(var + bn_eps)
            w2f = w2 * scale                            # fold BN scale
            b2f = (b2 - mean) * scale + beta            # fold BN shift

            # Zero-pad each weight block's rows to a multiple of 8 so packed-slab
            # row offsets stay sublane-aligned.
            w1p = jnp.zeros((in_pad, hidden_dim), jnp.float32).at[:in_dim].set(w1)
            w2p = jnp.zeros((hid_pad, hidden_dim), jnp.float32).at[:hidden_dim].set(w2f)
            w_blocks += [w1p, w2p]
            offsets += [off, off + in_pad]
            off += in_pad + hid_pad
            b_rows += [b1, b2f]
            in_dims.append(in_pad if i == 0 else hidden_dim)

        # One packed bf16 weight slab + one f32 bias slab -> 2 parameter DMAs
        # total instead of 4 * num_layers tiny ones.
        self.w_packed = jnp.concatenate(w_blocks, axis=0).astype(jnp.bfloat16)
        self.b_packed = jnp.concatenate(b_rows, axis=0)
        self.w_offsets = offsets
        self.in_dims = in_dims

    def __call__(self, x, edge_index):
        n = x.shape[0]
        n_pad = _round_up(n, 8)
        src = edge_index[0]
        dst = edge_index[1]
        # Dense aggregation matrix  M = A + (1+eps) I  with the self-loop folded
        # into the scatter (no jnp.eye temporary); bf16 halves the dominant DMA
        # and runs the aggregation on the MXU bf16 pipe with f32 accumulation.
        diag = jnp.arange(n)
        adj = (jnp.zeros((n_pad, n_pad), jnp.float32)
               .at[dst, src].add(1.0)
               .at[diag, diag].add(1.0 + self.gin_eps)
               .astype(jnp.bfloat16))
        # bf16 node features, zero-padded to (n_pad, in0_pad).
        h = jnp.zeros((n_pad, self.in0_pad), jnp.bfloat16).at[
            :n, :self.isize].set(x.astype(jnp.bfloat16))
        out = gnn_forward_pallas(adj, h, self.w_packed, self.b_packed,
                                 hidden=self.hidden_dim,
                                 num_layers=self.num_gc_layers,
                                 w_offsets=self.w_offsets,
                                 in_dims=self.in_dims)
        return out[:n]


if __name__ == "__main__":
    key = jax.random.PRNGKey(0)
    num_gc_layers, isize, hidden_dim, drop_ratio = 3, 16, 32, 0.5
    n_nodes, n_edges = 64, 256

    k_feat, k_src, k_dst, k_param = jax.random.split(key, 4)
    x = jax.random.normal(k_feat, (n_nodes, isize), jnp.float32)
    src = jax.random.randint(k_src, (n_edges,), 0, n_nodes, dtype=jnp.int32)
    dst = jax.random.randint(k_dst, (n_edges,), 0, n_nodes, dtype=jnp.int32)
    edge_index = jnp.stack([src, dst], axis=0)      # [2, E], PyG convention

    model = GNNLearnerPallas(num_gc_layers, isize, hidden_dim, drop_ratio,
                             k_param)
    out = model(x, edge_index)
    jax.block_until_ready(out)

    assert out.shape == (n_nodes, hidden_dim * num_gc_layers), out.shape
    assert bool(jnp.all(jnp.isfinite(out)))
    print("KERNEL_OK")
</pallas_src>

<mosaic_0001>
module attributes {stable_mosaic.version = 11 : i64} {
  func.func @_fused_gnn_kernel(%arg0: i32, %arg1: memref<64x64xbf16, #tpu.memory_space<vmem>>, %arg2: memref<64x16xbf16, #tpu.memory_space<vmem>>, %arg3: memref<176x32xbf16, #tpu.memory_space<vmem>>, %arg4: memref<6x32xf32, #tpu.memory_space<vmem>>, %arg5: memref<64x128xf32, #tpu.memory_space<vmem>>) attributes {dimension_semantics = [#tpu.dimension_semantics<arbitrary>], iteration_bounds = array<i64: 1>, scalar_prefetch = 0 : i64, scratch_operands = 0 : i64, tpu.core_type = #tpu.core_type<tc>, window_params = [{pipeline_mode = #tpu.pipeline_mode<synchronous>, transform_indices = @transform_0, window_bounds = array<i64: 64, 64>}, {pipeline_mode = #tpu.pipeline_mode<synchronous>, transform_indices = @transform_1, window_bounds = array<i64: 64, 16>}, {pipeline_mode = #tpu.pipeline_mode<synchronous>, transform_indices = @transform_2, window_bounds = array<i64: 176, 32>}, {pipeline_mode = #tpu.pipeline_mode<synchronous>, transform_indices = @transform_3, window_bounds = array<i64: 6, 32>}, {pipeline_mode = #tpu.pipeline_mode<synchronous>, transform_indices = @transform_4, window_bounds = array<i64: 64, 128>}]} {
    %c0 = arith.constant 0 : index
    %c0_0 = arith.constant 0 : index
    %0 = vector.load %arg2[%c0, %c0_0] : memref<64x16xbf16, #tpu.memory_space<vmem>>, vector<64x16xbf16>
    %c0_1 = arith.constant 0 : index
    %c0_2 = arith.constant 0 : index
    %1 = vector.load %arg3[%c0_1, %c0_2] : memref<176x32xbf16, #tpu.memory_space<vmem>>, vector<16x32xbf16>
    %c16 = arith.constant 16 : index
    %c0_3 = arith.constant 0 : index
    %2 = vector.load %arg3[%c16, %c0_3] : memref<176x32xbf16, #tpu.memory_space<vmem>>, vector<32x32xbf16>
    %c0_4 = arith.constant 0 : index
    %c0_5 = arith.constant 0 : index
    %3 = vector.load %arg4[%c0_4, %c0_5] : memref<6x32xf32, #tpu.memory_space<vmem>>, vector<1x32xf32>
    %c1 = arith.constant 1 : index
    %c0_6 = arith.constant 0 : index
    %4 = vector.load %arg4[%c1, %c0_6] : memref<6x32xf32, #tpu.memory_space<vmem>>, vector<1x32xf32>
    %c0_7 = arith.constant 0 : index
    %c0_8 = arith.constant 0 : index
    %5 = vector.load %arg1[%c0_7, %c0_8] : memref<64x64xbf16, #tpu.memory_space<vmem>>, vector<64x64xbf16>
    %cst = arith.constant dense<0.000000e+00> : vector<64x16xf32>
    %6 = tpu.matmul %5, %0, %cst {dimension_numbers = #tpu.dot_dimension_numbers<[1], [0], [0], [1], [0, 0, 1, 1], [], []>} : vector<64x64xbf16>, vector<64x16xbf16>, vector<64x16xf32> -> vector<64x16xf32>
    %7 = arith.truncf %6 : vector<64x16xf32> to vector<64x16xbf16>
    %cst_9 = arith.constant dense<0.000000e+00> : vector<64x32xf32>
    %8 = tpu.matmul %7, %1, %cst_9 {dimension_numbers = #tpu.dot_dimension_numbers<[1], [0], [0], [1], [0, 0, 1, 1], [], []>} : vector<64x16xbf16>, vector<16x32xbf16>, vector<64x32xf32> -> vector<64x32xf32>
    %9 = vector.broadcast %3 : vector<1x32xf32> to vector<64x32xf32>
    %10 = arith.addf %8, %9 : vector<64x32xf32>
    %cst_10 = arith.constant 0.000000e+00 : f32
    %11 = vector.broadcast %cst_10 : f32 to vector<64x32xf32>
    %12 = arith.maximumf %10, %11 : vector<64x32xf32>
    %13 = arith.truncf %12 : vector<64x32xf32> to vector<64x32xbf16>
    %cst_11 = arith.constant dense<0.000000e+00> : vector<64x32xf32>
    %14 = tpu.matmul %13, %2, %cst_11 {dimension_numbers = #tpu.dot_dimension_numbers<[1], [0], [0], [1], [0, 0, 1, 1], [], []>} : vector<64x32xbf16>, vector<32x32xbf16>, vector<64x32xf32> -> vector<64x32xf32>
    %15 = vector.broadcast %4 : vector<1x32xf32> to vector<64x32xf32>
    %16 = arith.addf %14, %15 : vector<64x32xf32>
    %cst_12 = arith.constant 0.000000e+00 : f32
    %17 = vector.broadcast %cst_12 : f32 to vector<64x32xf32>
    %18 = arith.maximumf %16, %17 : vector<64x32xf32>
    %c0_13 = arith.constant 0 : index
    %c0_14 = arith.constant 0 : index
    %19 = vector.load %arg5[%c0_13, %c0_14] : memref<64x128xf32, #tpu.memory_space<vmem>>, vector<64x32xf32>
    tpu.vector_store %arg5[%c0_13, %c0_14], %18 {strides = array<i32>} : memref<64x128xf32, #tpu.memory_space<vmem>>, vector<64x32xf32>,
    %20 = arith.truncf %18 : vector<64x32xf32> to vector<64x32xbf16>
    %c48 = arith.constant 48 : index
    %c0_15 = arith.constant 0 : index
    %21 = vector.load %arg3[%c48, %c0_15] : memref<176x32xbf16, #tpu.memory_space<vmem>>, vector<32x32xbf16>
    %c80 = arith.constant 80 : index
    %c0_16 = arith.constant 0 : index
    %22 = vector.load %arg3[%c80, %c0_16] : memref<176x32xbf16, #tpu.memory_space<vmem>>, vector<32x32xbf16>
    %c2 = arith.constant 2 : index
    %c0_17 = arith.constant 0 : index
    %23 = vector.load %arg4[%c2, %c0_17] : memref<6x32xf32, #tpu.memory_space<vmem>>, vector<1x32xf32>
    %c3 = arith.constant 3 : index
    %c0_18 = arith.constant 0 : index
    %24 = vector.load %arg4[%c3, %c0_18] : memref<6x32xf32, #tpu.memory_space<vmem>>, vector<1x32xf32>
    %c0_19 = arith.constant 0 : index
    %c0_20 = arith.constant 0 : index
    %25 = vector.load %arg1[%c0_19, %c0_20] : memref<64x64xbf16, #tpu.memory_space<vmem>>, vector<64x64xbf16>
    %cst_21 = arith.constant dense<0.000000e+00> : vector<64x32xf32>
    %26 = tpu.matmul %25, %20, %cst_21 {dimension_numbers = #tpu.dot_dimension_numbers<[1], [0], [0], [1], [0, 0, 1, 1], [], []>} : vector<64x64xbf16>, vector<64x32xbf16>, vector<64x32xf32> -> vector<64x32xf32>
    %27 = arith.truncf %26 : vector<64x32xf32> to vector<64x32xbf16>
    %cst_22 = arith.constant dense<0.000000e+00> : vector<64x32xf32>
    %28 = tpu.matmul %27, %21, %cst_22 {dimension_numbers = #tpu.dot_dimension_numbers<[1], [0], [0], [1], [0, 0, 1, 1], [], []>} : vector<64x32xbf16>, vector<32x32xbf16>, vector<64x32xf32> -> vector<64x32xf32>
    %29 = vector.broadcast %23 : vector<1x32xf32> to vector<64x32xf32>
    %30 = arith.addf %28, %29 : vector<64x32xf32>
    %cst_23 = arith.constant 0.000000e+00 : f32
    %31 = vector.broadcast %cst_23 : f32 to vector<64x32xf32>
    %32 = arith.maximumf %30, %31 : vector<64x32xf32>
    %33 = arith.truncf %32 : vector<64x32xf32> to vector<64x32xbf16>
    %cst_24 = arith.constant dense<0.000000e+00> : vector<64x32xf32>
    %34 = tpu.matmul %33, %22, %cst_24 {dimension_numbers = #tpu.dot_dimension_numbers<[1], [0], [0], [1], [0, 0, 1, 1], [], []>} : vector<64x32xbf16>, vector<32x32xbf16>, vector<64x32xf32> -> vector<64x32xf32>
    %35 = vector.broadcast %24 : vector<1x32xf32> to vector<64x32xf32>
    %36 = arith.addf %34, %35 : vector<64x32xf32>
    %cst_25 = arith.constant 0.000000e+00 : f32
    %37 = vector.broadcast %cst_25 : f32 to vector<64x32xf32>
    %38 = arith.maximumf %36, %37 : vector<64x32xf32>
    %c0_26 = arith.constant 0 : index
    %c32 = arith.constant 32 : index
    %39 = vector.load %arg5[%c0_26, %c32] : memref<64x128xf32, #tpu.memory_space<vmem>>, vector<64x32xf32>
    tpu.vector_store %arg5[%c0_26, %c32], %38 {strides = array<i32>} : memref<64x128xf32, #tpu.memory_space<vmem>>, vector<64x32xf32>,
    %40 = arith.truncf %38 : vector<64x32xf32> to vector<64x32xbf16>
    %c112 = arith.constant 112 : index
    %c0_27 = arith.constant 0 : index
    %41 = vector.load %arg3[%c112, %c0_27] : memref<176x32xbf16, #tpu.memory_space<vmem>>, vector<32x32xbf16>
    %c144 = arith.constant 144 : index
    %c0_28 = arith.constant 0 : index
    %42 = vector.load %arg3[%c144, %c0_28] : memref<176x32xbf16, #tpu.memory_space<vmem>>, vector<32x32xbf16>
    %c4 = arith.constant 4 : index
    %c0_29 = arith.constant 0 : index
    %43 = vector.load %arg4[%c4, %c0_29] : memref<6x32xf32, #tpu.memory_space<vmem>>, vector<1x32xf32>
    %c5 = arith.constant 5 : index
    %c0_30 = arith.constant 0 : index
    %44 = vector.load %arg4[%c5, %c0_30] : memref<6x32xf32, #tpu.memory_space<vmem>>, vector<1x32xf32>
    %c0_31 = arith.constant 0 : index
    %c0_32 = arith.constant 0 : index
    %45 = vector.load %arg1[%c0_31, %c0_32] : memref<64x64xbf16, #tpu.memory_space<vmem>>, vector<64x64xbf16>
    %cst_33 = arith.constant dense<0.000000e+00> : vector<64x32xf32>
    %46 = tpu.matmul %45, %40, %cst_33 {dimension_numbers = #tpu.dot_dimension_numbers<[1], [0], [0], [1], [0, 0, 1, 1], [], []>} : vector<64x64xbf16>, vector<64x32xbf16>, vector<64x32xf32> -> vector<64x32xf32>
    %47 = arith.truncf %46 : vector<64x32xf32> to vector<64x32xbf16>
    %cst_34 = arith.constant dense<0.000000e+00> : vector<64x32xf32>
    %48 = tpu.matmul %47, %41, %cst_34 {dimension_numbers = #tpu.dot_dimension_numbers<[1], [0], [0], [1], [0, 0, 1, 1], [], []>} : vector<64x32xbf16>, vector<32x32xbf16>, vector<64x32xf32> -> vector<64x32xf32>
    %49 = vector.broadcast %43 : vector<1x32xf32> to vector<64x32xf32>
    %50 = arith.addf %48, %49 : vector<64x32xf32>
    %cst_35 = arith.constant 0.000000e+00 : f32
    %51 = vector.broadcast %cst_35 : f32 to vector<64x32xf32>
    %52 = arith.maximumf %50, %51 : vector<64x32xf32>
    %53 = arith.truncf %52 : vector<64x32xf32> to vector<64x32xbf16>
    %cst_36 = arith.constant dense<0.000000e+00> : vector<64x32xf32>
    %54 = tpu.matmul %53, %42, %cst_36 {dimension_numbers = #tpu.dot_dimension_numbers<[1], [0], [0], [1], [0, 0, 1, 1], [], []>} : vector<64x32xbf16>, vector<32x32xbf16>, vector<64x32xf32> -> vector<64x32xf32>
    %55 = vector.broadcast %44 : vector<1x32xf32> to vector<64x32xf32>
    %56 = arith.addf %54, %55 : vector<64x32xf32>
    %c0_37 = arith.constant 0 : index
    %c64 = arith.constant 64 : index
    %57 = vector.load %arg5[%c0_37, %c64] : memref<64x128xf32, #tpu.memory_space<vmem>>, vector<64x32xf32>
    tpu.vector_store %arg5[%c0_37, %c64], %56 {strides = array<i32>} : memref<64x128xf32, #tpu.memory_space<vmem>>, vector<64x32xf32>,
    %cst_38 = arith.constant 0.000000e+00 : f32
    %58 = vector.broadcast %cst_38 : f32 to vector<64x32xf32>
    %c0_39 = arith.constant 0 : index
    %c96 = arith.constant 96 : index
    %59 = vector.load %arg5[%c0_39, %c96] : memref<64x128xf32, #tpu.memory_space<vmem>>, vector<64x32xf32>
    tpu.vector_store %arg5[%c0_39, %c96], %58 {strides = array<i32>} : memref<64x128xf32, #tpu.memory_space<vmem>>, vector<64x32xf32>,
    return
  }
  func.func @transform_0(%arg0: i32) -> (i32, i32) {
    %c0_i32 = arith.constant 0 : i32
    %c0_i32_0 = arith.constant 0 : i32
    %c0_i32_1 = arith.constant 0 : i32
    return %c0_i32, %c0_i32_0 : i32, i32
  }
  func.func @transform_1(%arg0: i32) -> (i32, i32) {
    %c0_i32 = arith.constant 0 : i32
    %c0_i32_0 = arith.constant 0 : i32
    %c0_i32_1 = arith.constant 0 : i32
    return %c0_i32, %c0_i32_0 : i32, i32
  }
  func.func @transform_2(%arg0: i32) -> (i32, i32) {
    %c0_i32 = arith.constant 0 : i32
    %c0_i32_0 = arith.constant 0 : i32
    %c0_i32_1 = arith.constant 0 : i32
    return %c0_i32, %c0_i32_0 : i32, i32
  }
  func.func @transform_3(%arg0: i32) -> (i32, i32) {
    %c0_i32 = arith.constant 0 : i32
    %c0_i32_0 = arith.constant 0 : i32
    %c0_i32_1 = arith.constant 0 : i32
    return %c0_i32, %c0_i32_0 : i32, i32
  }
  func.func @transform_4(%arg0: i32) -> (i32, i32) {
    %c0_i32 = arith.constant 0 : i32
    %c0_i32_0 = arith.constant 0 : i32
    %c0_i32_1 = arith.constant 0 : i32
    return %c0_i32, %c0_i32_0 : i32, i32
  }
}

module attributes {stable_mosaic.version = 11 : i64} {
  func.func @_fused_gnn_kernel(%arg0: i32, %arg1: memref<64x64xbf16, #tpu.memory_space<vmem>>, %arg2: memref<64x16xbf16, #tpu.memory_space<vmem>>, %arg3: memref<176x32xbf16, #tpu.memory_space<vmem>>, %arg4: memref<6x32xf32, #tpu.memory_space<vmem>>, %arg5: memref<64x128xf32, #tpu.memory_space<vmem>>) attributes {dimension_semantics = [#tpu.dimension_semantics<arbitrary>], iteration_bounds = array<i64: 1>, scalar_prefetch = 0 : i64, scratch_operands = 0 : i64, tpu.core_type = #tpu.core_type<tc>, window_params = [{pipeline_mode = #tpu.pipeline_mode<synchronous>, transform_indices = @transform_0, window_bounds = array<i64: 64, 64>}, {pipeline_mode = #tpu.pipeline_mode<synchronous>, transform_indices = @transform_1, window_bounds = array<i64: 64, 16>}, {pipeline_mode = #tpu.pipeline_mode<synchronous>, transform_indices = @transform_2, window_bounds = array<i64: 176, 32>}, {pipeline_mode = #tpu.pipeline_mode<synchronous>, transform_indices = @transform_3, window_bounds = array<i64: 6, 32>}, {pipeline_mode = #tpu.pipeline_mode<synchronous>, transform_indices = @transform_4, window_bounds = array<i64: 64, 128>}]} {
    %c0 = arith.constant 0 : index
    %c0_0 = arith.constant 0 : index
    %0 = vector.load %arg2[%c0, %c0_0] : memref<64x16xbf16, #tpu.memory_space<vmem>>, vector<64x16xbf16>
    %c0_1 = arith.constant 0 : index
    %c0_2 = arith.constant 0 : index
    %1 = vector.load %arg3[%c0_1, %c0_2] : memref<176x32xbf16, #tpu.memory_space<vmem>>, vector<16x32xbf16>
    %c16 = arith.constant 16 : index
    %c0_3 = arith.constant 0 : index
    %2 = vector.load %arg3[%c16, %c0_3] : memref<176x32xbf16, #tpu.memory_space<vmem>>, vector<32x32xbf16>
    %c0_4 = arith.constant 0 : index
    %c0_5 = arith.constant 0 : index
    %3 = vector.load %arg4[%c0_4, %c0_5] : memref<6x32xf32, #tpu.memory_space<vmem>>, vector<1x32xf32>
    %c1 = arith.constant 1 : index
    %c0_6 = arith.constant 0 : index
    %4 = vector.load %arg4[%c1, %c0_6] : memref<6x32xf32, #tpu.memory_space<vmem>>, vector<1x32xf32>
    %c0_7 = arith.constant 0 : index
    %c0_8 = arith.constant 0 : index
    %5 = vector.load %arg1[%c0_7, %c0_8] : memref<64x64xbf16, #tpu.memory_space<vmem>>, vector<64x64xbf16>
    %cst = arith.constant dense<0.000000e+00> : vector<64x16xf32>
    %6 = tpu.matmul %5, %0, %cst {dimension_numbers = #tpu.dot_dimension_numbers<[1], [0], [0], [1], [0, 0, 1, 1], [], []>} : vector<64x64xbf16>, vector<64x16xbf16>, vector<64x16xf32> -> vector<64x16xf32>
    %7 = arith.truncf %6 : vector<64x16xf32> to vector<64x16xbf16>
    %cst_9 = arith.constant dense<0.000000e+00> : vector<64x32xf32>
    %8 = tpu.matmul %7, %1, %cst_9 {dimension_numbers = #tpu.dot_dimension_numbers<[1], [0], [0], [1], [0, 0, 1, 1], [], []>} : vector<64x16xbf16>, vector<16x32xbf16>, vector<64x32xf32> -> vector<64x32xf32>
    %9 = vector.broadcast %3 : vector<1x32xf32> to vector<64x32xf32>
    %10 = arith.addf %8, %9 : vector<64x32xf32>
    %cst_10 = arith.constant 0.000000e+00 : f32
    %11 = vector.broadcast %cst_10 : f32 to vector<64x32xf32>
    %12 = arith.maximumf %10, %11 : vector<64x32xf32>
    %13 = arith.truncf %12 : vector<64x32xf32> to vector<64x32xbf16>
    %cst_11 = arith.constant dense<0.000000e+00> : vector<64x32xf32>
    %14 = tpu.matmul %13, %2, %cst_11 {dimension_numbers = #tpu.dot_dimension_numbers<[1], [0], [0], [1], [0, 0, 1, 1], [], []>} : vector<64x32xbf16>, vector<32x32xbf16>, vector<64x32xf32> -> vector<64x32xf32>
    %15 = vector.broadcast %4 : vector<1x32xf32> to vector<64x32xf32>
    %16 = arith.addf %14, %15 : vector<64x32xf32>
    %cst_12 = arith.constant 0.000000e+00 : f32
    %17 = vector.broadcast %cst_12 : f32 to vector<64x32xf32>
    %18 = arith.maximumf %16, %17 : vector<64x32xf32>
    %c0_13 = arith.constant 0 : index
    %c0_14 = arith.constant 0 : index
    %19 = vector.load %arg5[%c0_13, %c0_14] : memref<64x128xf32, #tpu.memory_space<vmem>>, vector<64x32xf32>
    tpu.vector_store %arg5[%c0_13, %c0_14], %18 {strides = array<i32>} : memref<64x128xf32, #tpu.memory_space<vmem>>, vector<64x32xf32>,
    %20 = arith.truncf %18 : vector<64x32xf32> to vector<64x32xbf16>
    %c48 = arith.constant 48 : index
    %c0_15 = arith.constant 0 : index
    %21 = vector.load %arg3[%c48, %c0_15] : memref<176x32xbf16, #tpu.memory_space<vmem>>, vector<32x32xbf16>
    %c80 = arith.constant 80 : index
    %c0_16 = arith.constant 0 : index
    %22 = vector.load %arg3[%c80, %c0_16] : memref<176x32xbf16, #tpu.memory_space<vmem>>, vector<32x32xbf16>
    %c2 = arith.constant 2 : index
    %c0_17 = arith.constant 0 : index
    %23 = vector.load %arg4[%c2, %c0_17] : memref<6x32xf32, #tpu.memory_space<vmem>>, vector<1x32xf32>
    %c3 = arith.constant 3 : index
    %c0_18 = arith.constant 0 : index
    %24 = vector.load %arg4[%c3, %c0_18] : memref<6x32xf32, #tpu.memory_space<vmem>>, vector<1x32xf32>
    %c0_19 = arith.constant 0 : index
    %c0_20 = arith.constant 0 : index
    %25 = vector.load %arg1[%c0_19, %c0_20] : memref<64x64xbf16, #tpu.memory_space<vmem>>, vector<64x64xbf16>
    %cst_21 = arith.constant dense<0.000000e+00> : vector<64x32xf32>
    %26 = tpu.matmul %25, %20, %cst_21 {dimension_numbers = #tpu.dot_dimension_numbers<[1], [0], [0], [1], [0, 0, 1, 1], [], []>} : vector<64x64xbf16>, vector<64x32xbf16>, vector<64x32xf32> -> vector<64x32xf32>
    %27 = arith.truncf %26 : vector<64x32xf32> to vector<64x32xbf16>
    %cst_22 = arith.constant dense<0.000000e+00> : vector<64x32xf32>
    %28 = tpu.matmul %27, %21, %cst_22 {dimension_numbers = #tpu.dot_dimension_numbers<[1], [0], [0], [1], [0, 0, 1, 1], [], []>} : vector<64x32xbf16>, vector<32x32xbf16>, vector<64x32xf32> -> vector<64x32xf32>
    %29 = vector.broadcast %23 : vector<1x32xf32> to vector<64x32xf32>
    %30 = arith.addf %28, %29 : vector<64x32xf32>
    %cst_23 = arith.constant 0.000000e+00 : f32
    %31 = vector.broadcast %cst_23 : f32 to vector<64x32xf32>
    %32 = arith.maximumf %30, %31 : vector<64x32xf32>
    %33 = arith.truncf %32 : vector<64x32xf32> to vector<64x32xbf16>
    %cst_24 = arith.constant dense<0.000000e+00> : vector<64x32xf32>
    %34 = tpu.matmul %33, %22, %cst_24 {dimension_numbers = #tpu.dot_dimension_numbers<[1], [0], [0], [1], [0, 0, 1, 1], [], []>} : vector<64x32xbf16>, vector<32x32xbf16>, vector<64x32xf32> -> vector<64x32xf32>
    %35 = vector.broadcast %24 : vector<1x32xf32> to vector<64x32xf32>
    %36 = arith.addf %34, %35 : vector<64x32xf32>
    %cst_25 = arith.constant 0.000000e+00 : f32
    %37 = vector.broadcast %cst_25 : f32 to vector<64x32xf32>
    %38 = arith.maximumf %36, %37 : vector<64x32xf32>
    %c0_26 = arith.constant 0 : index
    %c32 = arith.constant 32 : index
    %39 = vector.load %arg5[%c0_26, %c32] : memref<64x128xf32, #tpu.memory_space<vmem>>, vector<64x32xf32>
    tpu.vector_store %arg5[%c0_26, %c32], %38 {strides = array<i32>} : memref<64x128xf32, #tpu.memory_space<vmem>>, vector<64x32xf32>,
    %40 = arith.truncf %38 : vector<64x32xf32> to vector<64x32xbf16>
    %c112 = arith.constant 112 : index
    %c0_27 = arith.constant 0 : index
    %41 = vector.load %arg3[%c112, %c0_27] : memref<176x32xbf16, #tpu.memory_space<vmem>>, vector<32x32xbf16>
    %c144 = arith.constant 144 : index
    %c0_28 = arith.constant 0 : index
    %42 = vector.load %arg3[%c144, %c0_28] : memref<176x32xbf16, #tpu.memory_space<vmem>>, vector<32x32xbf16>
    %c4 = arith.constant 4 : index
    %c0_29 = arith.constant 0 : index
    %43 = vector.load %arg4[%c4, %c0_29] : memref<6x32xf32, #tpu.memory_space<vmem>>, vector<1x32xf32>
    %c5 = arith.constant 5 : index
    %c0_30 = arith.constant 0 : index
    %44 = vector.load %arg4[%c5, %c0_30] : memref<6x32xf32, #tpu.memory_space<vmem>>, vector<1x32xf32>
    %c0_31 = arith.constant 0 : index
    %c0_32 = arith.constant 0 : index
    %45 = vector.load %arg1[%c0_31, %c0_32] : memref<64x64xbf16, #tpu.memory_space<vmem>>, vector<64x64xbf16>
    %cst_33 = arith.constant dense<0.000000e+00> : vector<64x32xf32>
    %46 = tpu.matmul %45, %40, %cst_33 {dimension_numbers = #tpu.dot_dimension_numbers<[1], [0], [0], [1], [0, 0, 1, 1], [], []>} : vector<64x64xbf16>, vector<64x32xbf16>, vector<64x32xf32> -> vector<64x32xf32>
    %47 = arith.truncf %46 : vector<64x32xf32> to vector<64x32xbf16>
    %cst_34 = arith.constant dense<0.000000e+00> : vector<64x32xf32>
    %48 = tpu.matmul %47, %41, %cst_34 {dimension_numbers = #tpu.dot_dimension_numbers<[1], [0], [0], [1], [0, 0, 1, 1], [], []>} : vector<64x32xbf16>, vector<32x32xbf16>, vector<64x32xf32> -> vector<64x32xf32>
    %49 = vector.broadcast %43 : vector<1x32xf32> to vector<64x32xf32>
    %50 = arith.addf %48, %49 : vector<64x32xf32>
    %cst_35 = arith.constant 0.000000e+00 : f32
    %51 = vector.broadcast %cst_35 : f32 to vector<64x32xf32>
    %52 = arith.maximumf %50, %51 : vector<64x32xf32>
    %53 = arith.truncf %52 : vector<64x32xf32> to vector<64x32xbf16>
    %cst_36 = arith.constant dense<0.000000e+00> : vector<64x32xf32>
    %54 = tpu.matmul %53, %42, %cst_36 {dimension_numbers = #tpu.dot_dimension_numbers<[1], [0], [0], [1], [0, 0, 1, 1], [], []>} : vector<64x32xbf16>, vector<32x32xbf16>, vector<64x32xf32> -> vector<64x32xf32>
    %55 = vector.broadcast %44 : vector<1x32xf32> to vector<64x32xf32>
    %56 = arith.addf %54, %55 : vector<64x32xf32>
    %c0_37 = arith.constant 0 : index
    %c64 = arith.constant 64 : index
    %57 = vector.load %arg5[%c0_37, %c64] : memref<64x128xf32, #tpu.memory_space<vmem>>, vector<64x32xf32>
    tpu.vector_store %arg5[%c0_37, %c64], %56 {strides = array<i32>} : memref<64x128xf32, #tpu.memory_space<vmem>>, vector<64x32xf32>,
    %cst_38 = arith.constant 0.000000e+00 : f32
    %58 = vector.broadcast %cst_38 : f32 to vector<64x32xf32>
    %c0_39 = arith.constant 0 : index
    %c96 = arith.constant 96 : index
    %59 = vector.load %arg5[%c0_39, %c96] : memref<64x128xf32, #tpu.memory_space<vmem>>, vector<64x32xf32>
    tpu.vector_store %arg5[%c0_39, %c96], %58 {strides = array<i32>} : memref<64x128xf32, #tpu.memory_space<vmem>>, vector<64x32xf32>,
    return
  }
  func.func @transform_0(%arg0: i32) -> (i32, i32) {
    %c0_i32 = arith.constant 0 : i32
    %c0_i32_0 = arith.constant 0 : i32
    %c0_i32_1 = arith.constant 0 : i32
    return %c0_i32, %c0_i32_0 : i32, i32
  }
  func.func @transform_1(%arg0: i32) -> (i32, i32) {
    %c0_i32 = arith.constant 0 : i32
    %c0_i32_0 = arith.constant 0 : i32
    %c0_i32_1 = arith.constant 0 : i32
    return %c0_i32, %c0_i32_0 : i32, i32
  }
  func.func @transform_2(%arg0: i32) -> (i32, i32) {
    %c0_i32 = arith.constant 0 : i32
    %c0_i32_0 = arith.constant 0 : i32
    %c0_i32_1 = arith.constant 0 : i32
    return %c0_i32, %c0_i32_0 : i32, i32
  }
  func.func @transform_3(%arg0: i32) -> (i32, i32) {
    %c0_i32 = arith.constant 0 : i32
    %c0_i32_0 = arith.constant 0 : i32
    %c0_i32_1 = arith.constant 0 : i32
    return %c0_i32, %c0_i32_0 : i32, i32
  }
  func.func @transform_4(%arg0: i32) -> (i32, i32) {
    %c0_i32 = arith.constant 0 : i32
    %c0_i32_0 = arith.constant 0 : i32
    %c0_i32_1 = arith.constant 0 : i32
    return %c0_i32, %c0_i32_0 : i32, i32
  }
}

</mosaic_0001>

<bundles_post_ra>
// kernel: tpu_custom_call.1
= control target key start
LH: loop header
LB: loop body
LE: loop exit
PB: predicated region body
PF: predicated region fallthrough
CT: control target
= control target key end

     0   :  { %vm87_vm0 = vcmask 523264   ;;  %s1653_s0 = inlined_call_operand.vmem [shape: bf16[64,64], index: 0, kind: input, shape index: {}]   ;;  %s1654_s1 = inlined_call_operand.vmem [shape: bf16[64,16], index: 1, kind: input, shape index: {}]   ;;  %s1655_s2 = inlined_call_operand.vmem [shape: bf16[176,32], index: 2, kind: input, shape index: {}]   ;;  %s1656_s3 = inlined_call_operand.vmem [shape: f32[6,32], index: 3, kind: input, shape index: {}]   ;;  %s1657_s4 = inlined_call_operand.hbm [shape: f32[64,128], index: 4, kind: output, shape index: {}]  }
   0x1   :  { %v1388_v0 = vld [vmem:[%s1654_s1] sm:$0xff]   ;;  %v1389_v1 = vld [vmem:[%s1654_s1 + $0x8] sm:$0xff]   ;;  %v1390_v2 = vld [vmem:[%s1654_s1 + $0x10] sm:$0xff]  }
   0x2   :  { %1264 = vmatprep.subr.bf16.mxu0 %v1388_v0  ;;  %v1392_v3 = vld [vmem:[%s1653_s0] sm:$0xff]   ;;  %v1391_v4 = vld [vmem:[%s1654_s1 + $0x18] sm:$0xff]   ;;  %v1393_v5 = vld [vmem:[%s1653_s0 + $0x8] sm:$0xff]  }
   0x3   :  { %1265 = vmatpush3.bf16.msra.mxu0 %v1388_v0  ;;  %1272 = vmatprep.mubr.msk.bf16.mxu0 %vm87_vm0, %v1392_v3  ;;  %v1394_v6 = vld [vmem:[%s1653_s0 + $0x10] sm:$0xff]  }
   0x4   :  { %1266 = vmatprep.subr.bf16.mxu0 %v1389_v1 }
   0x7   :  { %1267 = vmatpush3.bf16.msra.mxu0 %v1389_v1 }
   0x8   :  { %1268 = vmatprep.subr.bf16.mxu0 %v1390_v2 }
   0xb   :  { %1269 = vmatpush3.bf16.msra.mxu0 %v1390_v2 }
   0xc   :  { %1270 = vmatprep.subr.bf16.mxu0 %v1391_v4 }
   0xf   :  { %1271 = vmatpush3.bf16.msra.mxu0 %v1391_v4 }
  0x12   :  { %1273 = vmatmul.mubr.msk.bf16.vlgmr.msra.gmra.mrb[0].mxu0 %vm87_vm0, %v1393_v5 }
  0x13   :  { %1276 = vmatprep.mubr.msk.bf16.mxu0 %vm87_vm0, %v1394_v6 }
  0x14   :  { %9 = vsyncpa [#allocation3], 0  ;;  %v1395_v7 = vld [vmem:[%s1653_s0 + $0x18] sm:$0xff]   ;;  %v1396_v8 = vld [vmem:[%s1655_s2] sm:$0xff]   ;;  %vm179_vm1 = vcmask 130048   ;;  %vm285_vm2 = vcmask 261120  }
  0x15   :  { %1280 = vmatprep.subr.bf16.mxu1 %v1396_v8  ;;  %v1397_v9 = vld [vmem:[%s1655_s2 + $0x8] sm:$0xff]   ;;  %v1398_v22 = vld [vmem:[%s1655_s2 + $0x10] sm:$0xff]   ;;  %v1148_v23 = vld [vmem:[%s1656_s3] ss:$0 sm:$0xff]  ;;  %s1439_s9 = smov 32   ;;  %vm740_vm3 = vcmask 523520  }
  0x16   :  { %1281 = vmatpush3.bf16.msra.mxu1 %v1396_v8  ;;  %v1399_v52 = vld [vmem:[%s1653_s0] sm:$0xff]   ;;  %v1403_v53 = vld [vmem:[%s1655_s2 + $0x18] sm:$0xff]   ;;  %s1440_s26 = smov 64   ;;  %vm1102_vm4 = vcmask 785920   ;;  %vm1111_vm5 = vcmask 1048320  }
  0x17   :  { %1290 = vmatprep.subr.bf16.mxu1 %v1397_v9  ;;  %v1404_v54 = vld [vmem:[%s1655_s2 + $0x20] sm:$0xff]  }
  0x18   :  { %v1154_v55 = vld [vmem:[%s1656_s3 + $0x1] ss:$0 sm:$0xff] }
  0x1a   :  { %1277 = vmatmul.mubr.msk.bf16.gmra.mrb[4].mxu0 %vm87_vm0, %v1395_v7 }
  0x1b   :  { %1310 = vmatprep.mubr.msk.bf16.mxu0 %vm87_vm0, %v1399_v52 }
  0xe5   :  { %v1274_v10 = vpop.f32.mrb[0].mxu0 }
  0xe6   :  { %v134_v11 = vpop.f32.mrb[1].mxu0 }
  0xe7   :  { %v1275_v12 = vpop.f32.mrb[2].mxu0 }
  0xe8   :  { %v166_v13 = vpack.c.bf16 %v1275_v12, %v1274_v10  ;;  %v137_v14 = vpop.f32.mrb[3].mxu0 }
  0xe9   :  { %v165_v15 = vpack.c.bf16 %v137_v14, %v134_v11 }
  0xeb   :  { %1282 = vmatprep.mubr.msk.bf16.mxu1 %vm179_vm1, %v165_v15 }
  0xec   :  { %1283 = vmatmul.mubr.msk.bf16.vlgmr.msra.gmra.mrb[0].mxu1 %vm179_vm1, %v166_v13 }
  0xed   :  { %v1278_v16 = vpop.f32.mrb[4].mxu0  ;;  %1291 = vmatpush3.bf16.msra.mxu1 %v1397_v9 }
  0xee   :  { %v150_v17 = vpop.f32.mrb[5].mxu0  ;;  %1292 = vmatprep.subr.bf16.mxu1 %v1398_v22 }
  0xef   :  { %v1279_v18 = vpop.f32.mrb[6].mxu0 }
  0xf0   :  { %v168_v19 = vpack.c.bf16 %v1279_v18, %v1278_v16  ;;  %v153_v20 = vpop.f32.mrb[7].mxu0 }
  0xf1   :  { %v167_v21 = vpack.c.bf16 %v153_v20, %v150_v17  ;;  %1293 = vmatpush3.bf16.msra.mxu1 %v1398_v22  ;;  %v1400_v20 = vld [vmem:[%s1653_s0 + $0x8] sm:$0xff]   ;;  %v1402_v22 = vld [vmem:[%s1653_s0 + $0x18] sm:$0xff]  }
  0xf2   :  { %1318 = vmatprep.subr.bf16.mxu1 %v1403_v53 }
  0xf3   :  { %1286 = vmatprep.mubr.msk.bf16.mxu1 %vm179_vm1, %v167_v21  ;;  %v1401_v21 = vld [vmem:[%s1653_s0 + $0x10] sm:$0xff]  }
  0xf4   :  { %1287 = vmatmul.mubr.msk.bf16.gmra.mrb[4].mxu1 %vm179_vm1, %v168_v19 }
 0x1bf   :  { %v1284_v24 = vpop.f32.mrb[0].mxu1 }
 0x1c0   :  { %v235_v25 = vadd.f32 %v1284_v24, %v1148_v23  ;;  %v226_v26 = vpop.f32.mrb[1].mxu1 }
 0x1c1   :  { %v227_v27 = vadd.f32 %v1148_v23, %v226_v26  ;;  %v1285_v28 = vpop.f32.mrb[2].mxu1 }
 0x1c2   :  { %v238_v29 = vadd.f32 %v1285_v28, %v1148_v23  ;;  %v229_v30 = vpop.f32.mrb[3].mxu1  ;;  %v259_v32 = vmax.f32 %v235_v25, 0.0 }
 0x1c3   :  { %v230_v31 = vadd.f32 %v1148_v23, %v229_v30  ;;  %v257_v34 = vmax.f32 %v227_v27, 0.0 }
 0x1c4   :  { %v260_v33 = vmax.f32 %v238_v29, 0.0 }
 0x1c5   :  { %v258_v35 = vmax.f32 %v230_v31, 0.0 }
 0x1c6   :  { %v266_v36 = vpack.c.bf16 %v260_v33, %v259_v32 }
 0x1c7   :  { %v265_v37 = vpack.c.bf16 %v258_v35, %v257_v34  ;;  %v1288_v38 = vpop.f32.mrb[4].mxu1 }
 0x1c8   :  { %v251_v39 = vadd.f32 %v1288_v38, %v1148_v23  ;;  %v242_v40 = vpop.f32.mrb[5].mxu1 }
 0x1c9   :  { %v243_v41 = vadd.f32 %v1148_v23, %v242_v40  ;;  %v1289_v42 = vpop.f32.mrb[6].mxu1  ;;  %1294 = vmatprep.mubr.msk.bf16.mxu1 %vm285_vm2, %v265_v37  ;;  %v1169_v37 = vld [vmem:[%s1656_s3 + $0x2] ss:$0 sm:$0xff] }
 0x1ca   :  { %v254_v43 = vadd.f32 %v1289_v42, %v1148_v23  ;;  %v245_v44 = vpop.f32.mrb[7].mxu1  ;;  %1295 = vmatmul.mubr.msk.bf16.vlgmr.msra.gmra.mrb[8].mxu1 %vm285_vm2, %v266_v36  ;;  %v263_v46 = vmax.f32 %v251_v39, 0.0  ;;  %v1406_v36 = vld [vmem:[%s1655_s2 + $0x30] sm:$0xff]  }
 0x1cb   :  { %v246_v45 = vadd.f32 %v1148_v23, %v245_v44  ;;  %v261_v48 = vmax.f32 %v243_v41, 0.0  ;;  %1319 = vmatpush3.bf16.msra.mxu1 %v1403_v53  ;;  %v1405_v23 = vld [vmem:[%s1655_s2 + $0x28] sm:$0xff]  }
 0x1cc   :  { %v264_v47 = vmax.f32 %v254_v43, 0.0  ;;  %1320 = vmatprep.subr.bf16.mxu1 %v1404_v54 }
 0x1cd   :  { %v262_v49 = vmax.f32 %v246_v45, 0.0 }
 0x1ce   :  { %v268_v50 = vpack.c.bf16 %v264_v47, %v263_v46 }
 0x1cf   :  { %v267_v51 = vpack.c.bf16 %v262_v49, %v261_v48  ;;  %1321 = vmatpush3.bf16.msra.mxu1 %v1404_v54 }
 0x1d1   :  { %1298 = vmatprep.mubr.msk.bf16.mxu1 %vm285_vm2, %v267_v51 }
 0x1d2   :  { %1299 = vmatmul.mubr.msk.bf16.gmra.mrb[12].mxu1 %vm285_vm2, %v268_v50 }
 0x29d   :  { %v1296_v56 = vpop.f32.mrb[8].mxu1 }
 0x29e   :  { %v341_v57 = vadd.f32 %v1296_v56, %v1154_v55  ;;  %v332_v58 = vpop.f32.mrb[9].mxu1 }
 0x29f   :  { %v333_v59 = vadd.f32 %v1154_v55, %v332_v58  ;;  %v1297_v60 = vpop.f32.mrb[10].mxu1 }
 0x2a0   :  { %v365_v61 = vmax.f32 %v341_v57, 0.0  ;;  %v344_v62 = vadd.f32 %v1297_v60, %v1154_v55  ;;  %v335_v63 = vpop.f32.mrb[11].mxu1 }
 0x2a1   :  { %v363_v0 = vmax.f32 %v333_v59, 0.0  ;;  %v336_v1 = vadd.f32 %v1154_v55, %v335_v63 }
 0x2a2   :  { %373 = vst.msk [vmem:[#allocation2 + $0x10] sm:$0xff] %vm285_vm2, %v365_v61  ;;  %v366_v2 = vmax.f32 %v344_v62, 0.0 }
 0x2a3   :  { %371 = vst.msk [vmem:[#allocation2] sm:$0xff] %vm285_vm2, %v363_v0  ;;  %v364_v3 = vmax.f32 %v336_v1, 0.0 }
 0x2a4   :  { %374 = vst.msk [vmem:[#allocation2 + $0x18] sm:$0xff] %vm285_vm2, %v366_v2  ;;  %v380_v4 = vpack.c.bf16 %v366_v2, %v365_v61  ;;  %v1407_v2 = vld [vmem:[%s1653_s0] sm:$0xff]  }
 0x2a5   :  { %372 = vst.msk [vmem:[#allocation2 + $0x8] sm:$0xff] %vm285_vm2, %v364_v3  ;;  %v379_v5 = vpack.c.bf16 %v364_v3, %v363_v0  ;;  %v1300_v6 = vpop.f32.mrb[12].mxu1  ;;  %v1176_v3 = vld [vmem:[%s1656_s3 + $0x3] ss:$0 sm:$0xff] }
 0x2a6   :  { %v357_v7 = vadd.f32 %v1300_v6, %v1154_v55  ;;  %v348_v8 = vpop.f32.mrb[13].mxu1 }
 0x2a7   :  { %v349_v9 = vadd.f32 %v1154_v55, %v348_v8  ;;  %v1301_v10 = vpop.f32.mrb[14].mxu1  ;;  %1302 = vmatprep.subr.bf16.mxu0 %v379_v5 }
 0x2a8   :  { %v369_v11 = vmax.f32 %v357_v7, 0.0  ;;  %v360_v12 = vadd.f32 %v1301_v10, %v1154_v55  ;;  %v351_v13 = vpop.f32.mrb[15].mxu1  ;;  %1303 = vmatpush3.bf16.msra.mxu0 %v379_v5 }
 0x2a9   :  { %v367_v14 = vmax.f32 %v349_v9, 0.0  ;;  %v352_v15 = vadd.f32 %v1154_v55, %v351_v13  ;;  %1304 = vmatprep.subr.bf16.mxu0 %v380_v4 }
 0x2aa   :  { %377 = vst.msk [vmem:[#allocation2 + $0x30] sm:$0xff] %vm285_vm2, %v369_v11  ;;  %v370_v16 = vmax.f32 %v360_v12, 0.0 }
 0x2ab   :  { %375 = vst.msk [vmem:[#allocation2 + $0x20] sm:$0xff] %vm285_vm2, %v367_v14  ;;  %v368_v17 = vmax.f32 %v352_v15, 0.0 }
 0x2ac   :  { %378 = vst.msk [vmem:[#allocation2 + $0x38] sm:$0xff] %vm285_vm2, %v370_v16  ;;  %v382_v18 = vpack.c.bf16 %v370_v16, %v369_v11  ;;  %1305 = vmatpush3.bf16.msra.mxu0 %v380_v4  ;;  %v1411_v16 = vld [vmem:[%s1655_s2 + $0x38] sm:$0xff]  }
 0x2ad   :  { %376 = vst.msk [vmem:[#allocation2 + $0x28] sm:$0xff] %vm285_vm2, %v368_v17  ;;  %v381_v19 = vpack.c.bf16 %v368_v17, %v367_v14 }
 0x2af   :  { %1306 = vmatprep.subr.bf16.mxu0 %v381_v19 }
 0x2b0   :  { %1307 = vmatpush3.bf16.msra.mxu0 %v381_v19 }
 0x2b1   :  { %1308 = vmatprep.subr.bf16.mxu0 %v382_v18 }
 0x2b4   :  { %1309 = vmatpush3.bf16.msra.mxu0 %v382_v18  ;;  %v1412_v18 = vld [vmem:[%s1655_s2 + $0x40] sm:$0xff]  }
 0x2b5   :  { %1330 = vmatprep.subr.bf16.mxu0 %v1405_v23 }
 0x2b7   :  { %1311 = vmatmul.mubr.msk.bf16.vlgmr.msra.gmra.mrb[8].mxu0 %vm87_vm0, %v1400_v20 }
 0x2b8   :  { %1314 = vmatprep.mubr.msk.bf16.mxu0 %vm87_vm0, %v1401_v21  ;;  %1331 = vmatpush3.bf16.msra.mxu0 %v1405_v23 }
 0x2b9   :  { %1332 = vmatprep.subr.bf16.mxu0 %v1406_v36 }
 0x2bc   :  { %1333 = vmatpush3.bf16.msra.mxu0 %v1406_v36  ;;  %v1410_v36 = vld [vmem:[%s1653_s0 + $0x18] sm:$0xff]  }
 0x2bd   :  { %1358 = vmatprep.subr.bf16.mxu0 %v1411_v16 }
 0x2bf   :  { %1315 = vmatmul.mubr.msk.bf16.gmra.mrb[12].mxu0 %vm87_vm0, %v1402_v22 }
 0x38a   :  { %v1312_v24 = vpop.f32.mrb[8].mxu0 }
 0x38b   :  { %v467_v25 = vpop.f32.mrb[9].mxu0 }
 0x38c   :  { %v1313_v26 = vpop.f32.mrb[10].mxu0 }
 0x38d   :  { %v499_v27 = vpack.c.bf16 %v1313_v26, %v1312_v24  ;;  %v470_v28 = vpop.f32.mrb[11].mxu0 }
 0x38e   :  { %v498_v29 = vpack.c.bf16 %v470_v28, %v467_v25 }
 0x390   :  { %1322 = vmatprep.mubr.msk.bf16.mxu1 %vm285_vm2, %v498_v29 }
 0x391   :  { %1323 = vmatmul.mubr.msk.bf16.vlgmr.msra.gmra.mrb[16].mxu1 %vm285_vm2, %v499_v27 }
 0x392   :  { %v1316_v30 = vpop.f32.mrb[12].mxu0 }
 0x393   :  { %v483_v31 = vpop.f32.mrb[13].mxu0 }
 0x394   :  { %v1317_v32 = vpop.f32.mrb[14].mxu0 }
 0x395   :  { %v501_v33 = vpack.c.bf16 %v1317_v32, %v1316_v30  ;;  %v486_v34 = vpop.f32.mrb[15].mxu0 }
 0x396   :  { %v500_v35 = vpack.c.bf16 %v486_v34, %v483_v31  ;;  %v1408_v34 = vld [vmem:[%s1653_s0 + $0x8] sm:$0xff]  }
 0x398   :  { %1326 = vmatprep.mubr.msk.bf16.mxu1 %vm285_vm2, %v500_v35  ;;  %v1409_v35 = vld [vmem:[%s1653_s0 + $0x10] sm:$0xff]  }
 0x399   :  { %1327 = vmatmul.mubr.msk.bf16.gmra.mrb[20].mxu1 %vm285_vm2, %v501_v33 }
 0x39a   :  { %1350 = vmatprep.mubr.msk.bf16.mxu1 %vm87_vm0, %v1407_v2 }
 0x464   :  { %v1324_v38 = vpop.f32.mrb[16].mxu1 }
 0x465   :  { %v573_v39 = vadd.f32 %v1324_v38, %v1169_v37  ;;  %v564_v40 = vpop.f32.mrb[17].mxu1 }
 0x466   :  { %v565_v41 = vadd.f32 %v1169_v37, %v564_v40  ;;  %v1325_v42 = vpop.f32.mrb[18].mxu1 }
 0x467   :  { %v576_v43 = vadd.f32 %v1325_v42, %v1169_v37  ;;  %v567_v44 = vpop.f32.mrb[19].mxu1  ;;  %v597_v46 = vmax.f32 %v573_v39, 0.0 }
 0x468   :  { %v568_v45 = vadd.f32 %v1169_v37, %v567_v44  ;;  %v595_v48 = vmax.f32 %v565_v41, 0.0  ;;  %v1413_v41 = vld [vmem:[%s1655_s2 + $0x48] sm:$0xff]  }
 0x469   :  { %v598_v47 = vmax.f32 %v576_v43, 0.0 }
 0x46a   :  { %v596_v49 = vmax.f32 %v568_v45, 0.0 }
 0x46b   :  { %v604_v50 = vpack.c.bf16 %v598_v47, %v597_v46 }
 0x46c   :  { %v603_v51 = vpack.c.bf16 %v596_v49, %v595_v48  ;;  %v1328_v52 = vpop.f32.mrb[20].mxu1 }
 0x46d   :  { %v589_v53 = vadd.f32 %v1328_v52, %v1169_v37  ;;  %v580_v54 = vpop.f32.mrb[21].mxu1 }
 0x46e   :  { %v581_v55 = vadd.f32 %v1169_v37, %v580_v54  ;;  %v1329_v56 = vpop.f32.mrb[22].mxu1  ;;  %1334 = vmatprep.mubr.msk.bf16.mxu0 %vm285_vm2, %v603_v51 }
 0x46f   :  { %v592_v57 = vadd.f32 %v1329_v56, %v1169_v37  ;;  %v583_v58 = vpop.f32.mrb[23].mxu1  ;;  %1335 = vmatmul.mubr.msk.bf16.vlgmr.msra.gmra.mrb[16].mxu0 %vm285_vm2, %v604_v50  ;;  %v601_v60 = vmax.f32 %v589_v53, 0.0 }
 0x470   :  { %v584_v59 = vadd.f32 %v1169_v37, %v583_v58  ;;  %v599_v62 = vmax.f32 %v581_v55, 0.0  ;;  %1359 = vmatpush3.bf16.msra.mxu0 %v1411_v16  ;;  %v1414_v58 = vld [vmem:[%s1655_s2 + $0x50] sm:$0xff]  }
 0x471   :  { %v602_v61 = vmax.f32 %v592_v57, 0.0  ;;  %1360 = vmatprep.subr.bf16.mxu0 %v1412_v18 }
 0x472   :  { %v600_v63 = vmax.f32 %v584_v59, 0.0  ;;  %v1191_v59 = vld [vmem:[%s1656_s3 + $0x4] ss:$0 sm:$0xff] }
 0x473   :  { %v606_v0 = vpack.c.bf16 %v602_v61, %v601_v60 }
 0x474   :  { %v605_v1 = vpack.c.bf16 %v600_v63, %v599_v62  ;;  %1361 = vmatpush3.bf16.msra.mxu0 %v1412_v18 }
 0x476   :  { %1338 = vmatprep.mubr.msk.bf16.mxu0 %vm285_vm2, %v605_v1 }
 0x477   :  { %1339 = vmatmul.mubr.msk.bf16.gmra.mrb[20].mxu0 %vm285_vm2, %v606_v0 }
 0x542   :  { %v1336_v4 = vpop.f32.mrb[16].mxu0 }
 0x543   :  { %v678_v5 = vadd.f32 %v1336_v4, %v1176_v3  ;;  %v669_v6 = vpop.f32.mrb[17].mxu0 }
 0x544   :  { %v670_v7 = vadd.f32 %v1176_v3, %v669_v6  ;;  %v1337_v8 = vpop.f32.mrb[18].mxu0 }
 0x545   :  { %v702_v9 = vmax.f32 %v678_v5, 0.0  ;;  %v681_v10 = vadd.f32 %v1337_v8, %v1176_v3  ;;  %v672_v11 = vpop.f32.mrb[19].mxu0 }
 0x546   :  { %v700_v12 = vmax.f32 %v670_v7, 0.0  ;;  %v673_v13 = vadd.f32 %v1176_v3, %v672_v11 }
 0x547   :  { %v703_v14 = vmax.f32 %v681_v10, 0.0  ;;  %720 = vrot.lane.b32.xlu1 %v702_v9, %s1439_s9 }
 0x548   :  { %v701_v15 = vmax.f32 %v673_v13, 0.0  ;;  %716 = vrot.lane.b32.xlu0 %v700_v12, %s1439_s9 }
 0x549   :  { %v750_v17 = vpack.c.bf16 %v703_v14, %v702_v9 }
 0x54a   :  { %v749_v19 = vpack.c.bf16 %v701_v15, %v700_v12  ;;  %v1340_v20 = vpop.f32.mrb[20].mxu0 }
 0x54b   :  { %v694_v21 = vadd.f32 %v1340_v20, %v1176_v3  ;;  %722 = vrot.lane.b32.xlu1 %v703_v14, %s1439_s9  ;;  %v685_v22 = vpop.f32.mrb[21].mxu0 }
 0x54c   :  { %v686_v23 = vadd.f32 %v1176_v3, %v685_v22  ;;  %718 = vrot.lane.b32.xlu0 %v701_v15, %s1439_s9  ;;  %v1341_v24 = vpop.f32.mrb[22].mxu0  ;;  %1342 = vmatprep.subr.bf16.mxu1 %v749_v19 }
 0x54d   :  { %v706_v25 = vmax.f32 %v694_v21, 0.0  ;;  %v697_v26 = vadd.f32 %v1341_v24, %v1176_v3  ;;  %v688_v27 = vpop.f32.mrb[23].mxu0  ;;  %1343 = vmatpush3.bf16.msra.mxu1 %v749_v19  ;;  %v1198_v24 = vld [vmem:[%s1656_s3 + $0x5] ss:$0 sm:$0xff]  ;;  %s1442_s3 = smov [#allocation2]  }
 0x54e   :  { %v689_v28 = vadd.f32 %v1176_v3, %v688_v27  ;;  %1344 = vmatprep.subr.bf16.mxu1 %v750_v17  ;;  %v704_v30 = vmax.f32 %v686_v23, 0.0  ;;  %s1125_s27 = sshll.u32 %s1442_s3, 4  ;;  %s1126_s27 = int_to_ptr.vmem [resolvable:$true] %s1125_s27 }
 0x54f   :  { %v707_v29 = vmax.f32 %v697_v26, 0.0  ;;  %s1415_s28 = scalar_lea.vmem %s1126_s27, 1024  ;;  %p1420_p1 = scmp.lt.s32.totalorder %s1126_s27, %s1126_s27 }
 0x550   :  { %v705_v31 = vmax.f32 %v689_v28, 0.0  ;;  %728 = vrot.lane.b32.xlu0 %v706_v25, %s1439_s9  ;;  %p1416_p0 = scmp.ne.s32.totalorder %s1126_s27, %s1415_s28  ;;  %p1421_p2 = scmp.lt.s32.totalorder %s1415_s28, %s1415_s28 }
 0x551   :  { %v752_v32 = vpack.c.bf16 %v707_v29, %v706_v25  ;;  %1345 = vmatpush3.bf16.msra.mxu1 %v750_v17  ;;  %730 = vrot.lane.b32.xlu1 %v707_v29, %s1439_s9 }
 0x552   :  { %v751_v33 = vpack.c.bf16 %v705_v31, %v704_v30  ;;  %p1422_p3 = por %p1421_p2, %p1420_p1 }
 0x554   :  { %724 = vrot.lane.b32.xlu0 %v704_v30, %s1439_s9  ;;  %1346 = vmatprep.subr.bf16.mxu1 %v751_v33  ;;  %p1423_p4 = pnand %p1422_p3, %p1416_p0 }
 0x555   :  { %726 = vrot.lane.b32.xlu1 %v705_v31, %s1439_s9  ;;  %1347 = vmatpush3.bf16.msra.mxu1 %v751_v33 }
 0x556   :  { %1348 = vmatprep.subr.bf16.mxu1 %v752_v32 }
 0x559   :  { %1349 = vmatpush3.bf16.msra.mxu1 %v752_v32 }
 0x55a   :  { %1370 = vmatprep.subr.bf16.mxu1 %v1413_v41 }
 0x55c   :  { %1351 = vmatmul.mubr.msk.bf16.vlgmr.msra.gmra.mrb[24].mxu1 %vm87_vm0, %v1408_v34 }
 0x55d   :  { %1354 = vmatprep.mubr.msk.bf16.mxu1 %vm87_vm0, %v1409_v35  ;;  %1371 = vmatpush3.bf16.msra.mxu1 %v1413_v41 }
 0x55e   :  { %1372 = vmatprep.subr.bf16.mxu1 %v1414_v58 }
 0x561   :  { %1373 = vmatpush3.bf16.msra.mxu1 %v1414_v58 }
 0x564   :  { %1355 = vmatmul.mubr.msk.bf16.gmra.mrb[28].mxu1 %vm87_vm0, %v1410_v36 }
 0x5b9   :  { %v721_v37 = vpop.permute.xlu1 %720 }
 0x5ba   :  { %743 = vst.msk [vmem:[#allocation2 + $0x10] sm:$0xff] %vm740_vm3, %v721_v37  ;;  %v717_v38 = vpop.permute.xlu0 %716 }
 0x5bb   :  { %741 = vst.msk [vmem:[#allocation2] sm:$0xff] %vm740_vm3, %v717_v38 }
 0x5bd   :  { %v723_v39 = vpop.permute.xlu1 %722 }
 0x5be   :  { %744 = vst.msk [vmem:[#allocation2 + $0x18] sm:$0xff] %vm740_vm3, %v723_v39  ;;  %v719_v40 = vpop.permute.xlu0 %718 }
 0x5bf   :  { %742 = vst.msk [vmem:[#allocation2 + $0x8] sm:$0xff] %vm740_vm3, %v719_v40 }
 0x5c2   :  { %v729_v42 = vpop.permute.xlu0 %728 }
 0x5c3   :  { %747 = vst.msk [vmem:[#allocation2 + $0x30] sm:$0xff] %vm740_vm3, %v729_v42  ;;  %v731_v43 = vpop.permute.xlu1 %730  ;;  %v1441_v42 = vmov 0.0  }
 0x5c4   :  { %748 = vst.msk [vmem:[#allocation2 + $0x38] sm:$0xff] %vm740_vm3, %v731_v43 }
 0x5c6   :  { %v725_v44 = vpop.permute.xlu0 %724 }
 0x5c7   :  { %745 = vst.msk [vmem:[#allocation2 + $0x20] sm:$0xff] %vm740_vm3, %v725_v44  ;;  %v727_v45 = vpop.permute.xlu1 %726 }
 0x5c8   :  { %746 = vst.msk [vmem:[#allocation2 + $0x28] sm:$0xff] %vm740_vm3, %v727_v45 }
 0x62f   :  { %v1352_v46 = vpop.f32.mrb[24].mxu1 }
 0x630   :  { %v837_v47 = vpop.f32.mrb[25].mxu1 }
 0x631   :  { %v1353_v48 = vpop.f32.mrb[26].mxu1 }
 0x632   :  { %v869_v49 = vpack.c.bf16 %v1353_v48, %v1352_v46  ;;  %v840_v50 = vpop.f32.mrb[27].mxu1 }
 0x633   :  { %v868_v51 = vpack.c.bf16 %v840_v50, %v837_v47 }
 0x635   :  { %1362 = vmatprep.mubr.msk.bf16.mxu0 %vm285_vm2, %v868_v51 }
 0x636   :  { %1363 = vmatmul.mubr.msk.bf16.vlgmr.msra.gmra.mrb[24].mxu0 %vm285_vm2, %v869_v49 }
 0x637   :  { %v1356_v52 = vpop.f32.mrb[28].mxu1 }
 0x638   :  { %v853_v53 = vpop.f32.mrb[29].mxu1 }
 0x639   :  { %v1357_v54 = vpop.f32.mrb[30].mxu1 }
 0x63a   :  { %v871_v55 = vpack.c.bf16 %v1357_v54, %v1356_v52  ;;  %v856_v56 = vpop.f32.mrb[31].mxu1 }
 0x63b   :  { %v870_v57 = vpack.c.bf16 %v856_v56, %v853_v53 }
 0x63d   :  { %1366 = vmatprep.mubr.msk.bf16.mxu0 %vm285_vm2, %v870_v57 }
 0x63e   :  { %1367 = vmatmul.mubr.msk.bf16.gmra.mrb[28].mxu0 %vm285_vm2, %v871_v55 }
 0x709   :  { %v1364_v60 = vpop.f32.mrb[24].mxu0 }
 0x70a   :  { %v943_v61 = vadd.f32 %v1364_v60, %v1191_v59  ;;  %v934_v62 = vpop.f32.mrb[25].mxu0 }
 0x70b   :  { %v935_v63 = vadd.f32 %v1191_v59, %v934_v62  ;;  %v1365_v0 = vpop.f32.mrb[26].mxu0 }
 0x70c   :  { %v946_v1 = vadd.f32 %v1365_v0, %v1191_v59  ;;  %v937_v2 = vpop.f32.mrb[27].mxu0  ;;  %v967_v4 = vmax.f32 %v943_v61, 0.0 }
 0x70d   :  { %v938_v3 = vadd.f32 %v1191_v59, %v937_v2  ;;  %v965_v6 = vmax.f32 %v935_v63, 0.0 }
 0x70e   :  { %v968_v5 = vmax.f32 %v946_v1, 0.0 }
 0x70f   :  { %v966_v7 = vmax.f32 %v938_v3, 0.0 }
 0x710   :  { %v974_v8 = vpack.c.bf16 %v968_v5, %v967_v4 }
 0x711   :  { %v973_v9 = vpack.c.bf16 %v966_v7, %v965_v6  ;;  %v1368_v10 = vpop.f32.mrb[28].mxu0 }
 0x712   :  { %v959_v11 = vadd.f32 %v1368_v10, %v1191_v59  ;;  %v950_v12 = vpop.f32.mrb[29].mxu0 }
 0x713   :  { %v951_v13 = vadd.f32 %v1191_v59, %v950_v12  ;;  %v1369_v14 = vpop.f32.mrb[30].mxu0  ;;  %1374 = vmatprep.mubr.msk.bf16.mxu1 %vm285_vm2, %v973_v9 }
 0x714   :  { %v962_v15 = vadd.f32 %v1369_v14, %v1191_v59  ;;  %v953_v16 = vpop.f32.mrb[31].mxu0  ;;  %1375 = vmatmul.mubr.msk.bf16.vlgmr.msra.gmra.mrb[32].mxu1 %vm285_vm2, %v974_v8  ;;  %v971_v18 = vmax.f32 %v959_v11, 0.0 }
 0x715   :  { %v954_v17 = vadd.f32 %v1191_v59, %v953_v16  ;;  %v969_v20 = vmax.f32 %v951_v13, 0.0 }
 0x716   :  { %v972_v19 = vmax.f32 %v962_v15, 0.0 }
 0x717   :  { %v970_v21 = vmax.f32 %v954_v17, 0.0 }
 0x718   :  { %v976_v22 = vpack.c.bf16 %v972_v19, %v971_v18 }
 0x719   :  { %v975_v23 = vpack.c.bf16 %v970_v21, %v969_v20 }
 0x71b   :  { %1378 = vmatprep.mubr.msk.bf16.mxu1 %vm285_vm2, %v975_v23 }
 0x71c   :  { %1379 = vmatmul.mubr.msk.bf16.gmra.mrb[36].mxu1 %vm285_vm2, %v976_v22 }
 0x7e7   :  { %v1376_v25 = vpop.f32.mrb[32].mxu1 }
 0x7e8   :  { %v1048_v26 = vadd.f32 %v1376_v25, %v1198_v24  ;;  %v1039_v27 = vpop.f32.mrb[33].mxu1 }
 0x7e9   :  { %v1377_v28 = vpop.f32.mrb[34].mxu1  ;;  %v1040_v31 = vadd.f32 %v1198_v24, %v1039_v27 }
 0x7ea   :  { %v1051_v29 = vadd.f32 %v1377_v28, %v1198_v24  ;;  %1082 = vrot.lane.b32.xlu0 %v1048_v26, %s1440_s26  ;;  %v1042_v30 = vpop.f32.mrb[35].mxu1 }
 0x7eb   :  { %v1043_v32 = vadd.f32 %v1198_v24, %v1042_v30 }
 0x7ec   :  { %1084 = vrot.lane.b32.xlu1 %v1051_v29, %s1440_s26 }
 0x7ee   :  { %1078 = vrot.lane.b32.xlu0 %v1040_v31, %s1440_s26 }
 0x7ef   :  { %v1380_v33 = vpop.f32.mrb[36].mxu1 }
 0x7f0   :  { %1080 = vrot.lane.b32.xlu1 %v1043_v32, %s1440_s26  ;;  %v1055_v34 = vpop.f32.mrb[37].mxu1  ;;  %v1064_v39 = vadd.f32 %v1380_v33, %v1198_v24 }
 0x7f1   :  { %v1056_v35 = vadd.f32 %v1198_v24, %v1055_v34  ;;  %v1381_v36 = vpop.f32.mrb[38].mxu1 }
 0x7f2   :  { %v1058_v37 = vpop.f32.mrb[39].mxu1  ;;  %v1067_v40 = vadd.f32 %v1381_v36, %v1198_v24 }
 0x7f3   :  { %v1059_v38 = vadd.f32 %v1198_v24, %v1058_v37  ;;  %1086 = vrot.lane.b32.xlu0 %v1056_v35, %s1440_s26 }
 0x7f5   :  { %1088 = vrot.lane.b32.xlu1 %v1059_v38, %s1440_s26 }
 0x7f7   :  { %1090 = vrot.lane.b32.xlu0 %v1064_v39, %s1440_s26 }
 0x7f9   :  { %1092 = vrot.lane.b32.xlu1 %v1067_v40, %s1440_s26 }
 0x85c   :  { %v1083_v41 = vpop.permute.xlu0 %1082 }
 0x85d   :  { %1105 = vst.msk [vmem:[#allocation2 + $0x10] sm:$0xff] %vm1102_vm4, %v1083_v41 }
 0x85e   :  { %1114 = vst.msk [vmem:[#allocation2 + $0x10] sm:$0xff] %vm1111_vm5, %v1441_v42  ;;  %v1085_v43 = vpop.permute.xlu1 %1084 }
 0x85f   :  { %1106 = vst.msk [vmem:[#allocation2 + $0x18] sm:$0xff] %vm1102_vm4, %v1085_v43 }
 0x860   :  { %1115 = vst.msk [vmem:[#allocation2 + $0x18] sm:$0xff] %vm1111_vm5, %v1441_v42  ;;  %v1079_v44 = vpop.permute.xlu0 %1078 }
 0x861   :  { %1103 = vst.msk [vmem:[#allocation2] sm:$0xff] %vm1102_vm4, %v1079_v44 }
 0x862   :  { %1112 = vst.msk [vmem:[#allocation2] sm:$0xff] %vm1111_vm5, %v1441_v42  ;;  %v1081_v45 = vpop.permute.xlu1 %1080 }
 0x863   :  { %1104 = vst.msk [vmem:[#allocation2 + $0x8] sm:$0xff] %vm1102_vm4, %v1081_v45 }
 0x864   :  { %1113 = vst.msk [vmem:[#allocation2 + $0x8] sm:$0xff] %vm1111_vm5, %v1441_v42 }
 0x865   :  { %v1087_v46 = vpop.permute.xlu0 %1086 }
 0x866   :  { %1107 = vst.msk [vmem:[#allocation2 + $0x20] sm:$0xff] %vm1102_vm4, %v1087_v46 }
 0x867   :  { %1116 = vst.msk [vmem:[#allocation2 + $0x20] sm:$0xff] %vm1111_vm5, %v1441_v42  ;;  %v1089_v47 = vpop.permute.xlu1 %1088 }
 0x868   :  { %1108 = vst.msk [vmem:[#allocation2 + $0x28] sm:$0xff] %vm1102_vm4, %v1089_v47 }
 0x869   :  { %1117 = vst.msk [vmem:[#allocation2 + $0x28] sm:$0xff] %vm1111_vm5, %v1441_v42  ;;  %v1091_v48 = vpop.permute.xlu0 %1090 }
 0x86a   :  { %1109 = vst.msk [vmem:[#allocation2 + $0x30] sm:$0xff] %vm1102_vm4, %v1091_v48 }
 0x86b   :  { %1118 = vst.msk [vmem:[#allocation2 + $0x30] sm:$0xff] %vm1111_vm5, %v1441_v42  ;;  %v1093_v49 = vpop.permute.xlu1 %1092 }
 0x86c   :  { %1110 = vst.msk [vmem:[#allocation2 + $0x38] sm:$0xff] %vm1102_vm4, %v1093_v49 }
 0x86d   :  { %1119 = vst.msk [vmem:[#allocation2 + $0x38] sm:$0xff] %vm1111_vm5, %v1441_v42 }
 0x86e   :  { %1426 = shalt.err (!%p1423_p4)
}
 0x86f   :  { %s1427_s1 = scalar_lea.hbm %s1657_s4, 1024 }
 0x870   :  { %p1428_p5 = scmp.ne.s32.totalorder %s1657_s4, %s1427_s1  ;;  %p1431_p6 = scmp.lt.u32.totalorder %s1427_s1, %s1657_s4 }
 0x872   :  { %p1433_p7 = pnand %p1431_p6, %p1428_p5 }
 0x874   :  { %1436 = shalt.err (!%p1433_p7)
}
 0x875   :  { %s1443_s9 = smov 128   ;;  %s1444_s10 = smov 8  }
 0x876   :  { %1131 = dma.vmem_to_hbm [thread:$0]  %s1126_s27, 1024, %s1657_s4, [#allocation3], %s1443_s9, %s1443_s9, %s1444_s10  }
 0x877   :  { %1437 = dma.done.wait [#allocation3], 1024  }
 0x878   :  { %1438 = vsyncadd [#allocation3], 4294966272 }
 0x879   :  { %1135 = vsyncpa [#allocation3], 1 }

// kernel: tpu_custom_call.1
= control target key start
LH: loop header
LB: loop body
LE: loop exit
PB: predicated region body
PF: predicated region fallthrough
CT: control target
= control target key end

     0   :  { %vm87_vm0 = vcmask 523264   ;;  %s1653_s0 = inlined_call_operand.vmem [shape: bf16[64,64], index: 0, kind: input, shape index: {}]   ;;  %s1654_s1 = inlined_call_operand.vmem [shape: bf16[64,16], index: 1, kind: input, shape index: {}]   ;;  %s1655_s2 = inlined_call_operand.vmem [shape: bf16[176,32], index: 2, kind: input, shape index: {}]   ;;  %s1656_s3 = inlined_call_operand.vmem [shape: f32[6,32], index: 3, kind: input, shape index: {}]   ;;  %s1657_s4 = inlined_call_operand.hbm [shape: f32[64,128], index: 4, kind: output, shape index: {}]  }
   0x1   :  { %v1388_v0 = vld [vmem:[%s1654_s1] sm:$0xff]   ;;  %v1389_v1 = vld [vmem:[%s1654_s1 + $0x8] sm:$0xff]   ;;  %v1390_v2 = vld [vmem:[%s1654_s1 + $0x10] sm:$0xff]  }
   0x2   :  { %1264 = vmatprep.subr.bf16.mxu0 %v1388_v0  ;;  %v1392_v3 = vld [vmem:[%s1653_s0] sm:$0xff]   ;;  %v1391_v4 = vld [vmem:[%s1654_s1 + $0x18] sm:$0xff]   ;;  %v1393_v5 = vld [vmem:[%s1653_s0 + $0x8] sm:$0xff]  }
   0x3   :  { %1265 = vmatpush3.bf16.msra.mxu0 %v1388_v0  ;;  %1272 = vmatprep.mubr.msk.bf16.mxu0 %vm87_vm0, %v1392_v3  ;;  %v1394_v6 = vld [vmem:[%s1653_s0 + $0x10] sm:$0xff]  }
   0x4   :  { %1266 = vmatprep.subr.bf16.mxu0 %v1389_v1 }
   0x7   :  { %1267 = vmatpush3.bf16.msra.mxu0 %v1389_v1 }
   0x8   :  { %1268 = vmatprep.subr.bf16.mxu0 %v1390_v2 }
   0xb   :  { %1269 = vmatpush3.bf16.msra.mxu0 %v1390_v2 }
   0xc   :  { %1270 = vmatprep.subr.bf16.mxu0 %v1391_v4 }
   0xf   :  { %1271 = vmatpush3.bf16.msra.mxu0 %v1391_v4 }
  0x12   :  { %1273 = vmatmul.mubr.msk.bf16.vlgmr.msra.gmra.mrb[0].mxu0 %vm87_vm0, %v1393_v5 }
  0x13   :  { %1276 = vmatprep.mubr.msk.bf16.mxu0 %vm87_vm0, %v1394_v6 }
  0x14   :  { %9 = vsyncpa [#allocation3], 0  ;;  %v1395_v7 = vld [vmem:[%s1653_s0 + $0x18] sm:$0xff]   ;;  %v1396_v8 = vld [vmem:[%s1655_s2] sm:$0xff]   ;;  %vm179_vm1 = vcmask 130048   ;;  %vm285_vm2 = vcmask 261120  }
  0x15   :  { %1280 = vmatprep.subr.bf16.mxu1 %v1396_v8  ;;  %v1397_v9 = vld [vmem:[%s1655_s2 + $0x8] sm:$0xff]   ;;  %v1398_v22 = vld [vmem:[%s1655_s2 + $0x10] sm:$0xff]   ;;  %v1148_v23 = vld [vmem:[%s1656_s3] ss:$0 sm:$0xff]  ;;  %s1439_s9 = smov 32   ;;  %vm740_vm3 = vcmask 523520  }
  0x16   :  { %1281 = vmatpush3.bf16.msra.mxu1 %v1396_v8  ;;  %v1399_v52 = vld [vmem:[%s1653_s0] sm:$0xff]   ;;  %v1403_v53 = vld [vmem:[%s1655_s2 + $0x18] sm:$0xff]   ;;  %s1440_s26 = smov 64   ;;  %vm1102_vm4 = vcmask 785920   ;;  %vm1111_vm5 = vcmask 1048320  }
  0x17   :  { %1290 = vmatprep.subr.bf16.mxu1 %v1397_v9  ;;  %v1404_v54 = vld [vmem:[%s1655_s2 + $0x20] sm:$0xff]  }
  0x18   :  { %v1154_v55 = vld [vmem:[%s1656_s3 + $0x1] ss:$0 sm:$0xff] }
  0x1a   :  { %1277 = vmatmul.mubr.msk.bf16.gmra.mrb[4].mxu0 %vm87_vm0, %v1395_v7 }
  0x1b   :  { %1310 = vmatprep.mubr.msk.bf16.mxu0 %vm87_vm0, %v1399_v52 }
  0xe5   :  { %v1274_v10 = vpop.f32.mrb[0].mxu0 }
  0xe6   :  { %v134_v11 = vpop.f32.mrb[1].mxu0 }
  0xe7   :  { %v1275_v12 = vpop.f32.mrb[2].mxu0 }
  0xe8   :  { %v166_v13 = vpack.c.bf16 %v1275_v12, %v1274_v10  ;;  %v137_v14 = vpop.f32.mrb[3].mxu0 }
  0xe9   :  { %v165_v15 = vpack.c.bf16 %v137_v14, %v134_v11 }
  0xeb   :  { %1282 = vmatprep.mubr.msk.bf16.mxu1 %vm179_vm1, %v165_v15 }
  0xec   :  { %1283 = vmatmul.mubr.msk.bf16.vlgmr.msra.gmra.mrb[0].mxu1 %vm179_vm1, %v166_v13 }
  0xed   :  { %v1278_v16 = vpop.f32.mrb[4].mxu0  ;;  %1291 = vmatpush3.bf16.msra.mxu1 %v1397_v9 }
  0xee   :  { %v150_v17 = vpop.f32.mrb[5].mxu0  ;;  %1292 = vmatprep.subr.bf16.mxu1 %v1398_v22 }
  0xef   :  { %v1279_v18 = vpop.f32.mrb[6].mxu0 }
  0xf0   :  { %v168_v19 = vpack.c.bf16 %v1279_v18, %v1278_v16  ;;  %v153_v20 = vpop.f32.mrb[7].mxu0 }
  0xf1   :  { %v167_v21 = vpack.c.bf16 %v153_v20, %v150_v17  ;;  %1293 = vmatpush3.bf16.msra.mxu1 %v1398_v22  ;;  %v1400_v20 = vld [vmem:[%s1653_s0 + $0x8] sm:$0xff]   ;;  %v1402_v22 = vld [vmem:[%s1653_s0 + $0x18] sm:$0xff]  }
  0xf2   :  { %1318 = vmatprep.subr.bf16.mxu1 %v1403_v53 }
  0xf3   :  { %1286 = vmatprep.mubr.msk.bf16.mxu1 %vm179_vm1, %v167_v21  ;;  %v1401_v21 = vld [vmem:[%s1653_s0 + $0x10] sm:$0xff]  }
  0xf4   :  { %1287 = vmatmul.mubr.msk.bf16.gmra.mrb[4].mxu1 %vm179_vm1, %v168_v19 }
 0x1bf   :  { %v1284_v24 = vpop.f32.mrb[0].mxu1 }
 0x1c0   :  { %v235_v25 = vadd.f32 %v1284_v24, %v1148_v23  ;;  %v226_v26 = vpop.f32.mrb[1].mxu1 }
 0x1c1   :  { %v227_v27 = vadd.f32 %v1148_v23, %v226_v26  ;;  %v1285_v28 = vpop.f32.mrb[2].mxu1 }
 0x1c2   :  { %v238_v29 = vadd.f32 %v1285_v28, %v1148_v23  ;;  %v229_v30 = vpop.f32.mrb[3].mxu1  ;;  %v259_v32 = vmax.f32 %v235_v25, 0.0 }
 0x1c3   :  { %v230_v31 = vadd.f32 %v1148_v23, %v229_v30  ;;  %v257_v34 = vmax.f32 %v227_v27, 0.0 }
 0x1c4   :  { %v260_v33 = vmax.f32 %v238_v29, 0.0 }
 0x1c5   :  { %v258_v35 = vmax.f32 %v230_v31, 0.0 }
 0x1c6   :  { %v266_v36 = vpack.c.bf16 %v260_v33, %v259_v32 }
 0x1c7   :  { %v265_v37 = vpack.c.bf16 %v258_v35, %v257_v34  ;;  %v1288_v38 = vpop.f32.mrb[4].mxu1 }
 0x1c8   :  { %v251_v39 = vadd.f32 %v1288_v38, %v1148_v23  ;;  %v242_v40 = vpop.f32.mrb[5].mxu1 }
 0x1c9   :  { %v243_v41 = vadd.f32 %v1148_v23, %v242_v40  ;;  %v1289_v42 = vpop.f32.mrb[6].mxu1  ;;  %1294 = vmatprep.mubr.msk.bf16.mxu1 %vm285_vm2, %v265_v37  ;;  %v1169_v37 = vld [vmem:[%s1656_s3 + $0x2] ss:$0 sm:$0xff] }
 0x1ca   :  { %v254_v43 = vadd.f32 %v1289_v42, %v1148_v23  ;;  %v245_v44 = vpop.f32.mrb[7].mxu1  ;;  %1295 = vmatmul.mubr.msk.bf16.vlgmr.msra.gmra.mrb[8].mxu1 %vm285_vm2, %v266_v36  ;;  %v263_v46 = vmax.f32 %v251_v39, 0.0  ;;  %v1406_v36 = vld [vmem:[%s1655_s2 + $0x30] sm:$0xff]  }
 0x1cb   :  { %v246_v45 = vadd.f32 %v1148_v23, %v245_v44  ;;  %v261_v48 = vmax.f32 %v243_v41, 0.0  ;;  %1319 = vmatpush3.bf16.msra.mxu1 %v1403_v53  ;;  %v1405_v23 = vld [vmem:[%s1655_s2 + $0x28] sm:$0xff]  }
 0x1cc   :  { %v264_v47 = vmax.f32 %v254_v43, 0.0  ;;  %1320 = vmatprep.subr.bf16.mxu1 %v1404_v54 }
 0x1cd   :  { %v262_v49 = vmax.f32 %v246_v45, 0.0 }
 0x1ce   :  { %v268_v50 = vpack.c.bf16 %v264_v47, %v263_v46 }
 0x1cf   :  { %v267_v51 = vpack.c.bf16 %v262_v49, %v261_v48  ;;  %1321 = vmatpush3.bf16.msra.mxu1 %v1404_v54 }
 0x1d1   :  { %1298 = vmatprep.mubr.msk.bf16.mxu1 %vm285_vm2, %v267_v51 }
 0x1d2   :  { %1299 = vmatmul.mubr.msk.bf16.gmra.mrb[12].mxu1 %vm285_vm2, %v268_v50 }
 0x29d   :  { %v1296_v56 = vpop.f32.mrb[8].mxu1 }
 0x29e   :  { %v341_v57 = vadd.f32 %v1296_v56, %v1154_v55  ;;  %v332_v58 = vpop.f32.mrb[9].mxu1 }
 0x29f   :  { %v333_v59 = vadd.f32 %v1154_v55, %v332_v58  ;;  %v1297_v60 = vpop.f32.mrb[10].mxu1 }
 0x2a0   :  { %v365_v61 = vmax.f32 %v341_v57, 0.0  ;;  %v344_v62 = vadd.f32 %v1297_v60, %v1154_v55  ;;  %v335_v63 = vpop.f32.mrb[11].mxu1 }
 0x2a1   :  { %v363_v0 = vmax.f32 %v333_v59, 0.0  ;;  %v336_v1 = vadd.f32 %v1154_v55, %v335_v63 }
 0x2a2   :  { %373 = vst.msk [vmem:[#allocation2 + $0x10] sm:$0xff] %vm285_vm2, %v365_v61  ;;  %v366_v2 = vmax.f32 %v344_v62, 0.0 }
 0x2a3   :  { %371 = vst.msk [vmem:[#allocation2] sm:$0xff] %vm285_vm2, %v363_v0  ;;  %v364_v3 = vmax.f32 %v336_v1, 0.0 }
 0x2a4   :  { %374 = vst.msk [vmem:[#allocation2 + $0x18] sm:$0xff] %vm285_vm2, %v366_v2  ;;  %v380_v4 = vpack.c.bf16 %v366_v2, %v365_v61  ;;  %v1407_v2 = vld [vmem:[%s1653_s0] sm:$0xff]  }
 0x2a5   :  { %372 = vst.msk [vmem:[#allocation2 + $0x8] sm:$0xff] %vm285_vm2, %v364_v3  ;;  %v379_v5 = vpack.c.bf16 %v364_v3, %v363_v0  ;;  %v1300_v6 = vpop.f32.mrb[12].mxu1  ;;  %v1176_v3 = vld [vmem:[%s1656_s3 + $0x3] ss:$0 sm:$0xff] }
 0x2a6   :  { %v357_v7 = vadd.f32 %v1300_v6, %v1154_v55  ;;  %v348_v8 = vpop.f32.mrb[13].mxu1 }
 0x2a7   :  { %v349_v9 = vadd.f32 %v1154_v55, %v348_v8  ;;  %v1301_v10 = vpop.f32.mrb[14].mxu1  ;;  %1302 = vmatprep.subr.bf16.mxu0 %v379_v5 }
 0x2a8   :  { %v369_v11 = vmax.f32 %v357_v7, 0.0  ;;  %v360_v12 = vadd.f32 %v1301_v10, %v1154_v55  ;;  %v351_v13 = vpop.f32.mrb[15].mxu1  ;;  %1303 = vmatpush3.bf16.msra.mxu0 %v379_v5 }
 0x2a9   :  { %v367_v14 = vmax.f32 %v349_v9, 0.0  ;;  %v352_v15 = vadd.f32 %v1154_v55, %v351_v13  ;;  %1304 = vmatprep.subr.bf16.mxu0 %v380_v4 }
 0x2aa   :  { %377 = vst.msk [vmem:[#allocation2 + $0x30] sm:$0xff] %vm285_vm2, %v369_v11  ;;  %v370_v16 = vmax.f32 %v360_v12, 0.0 }
 0x2ab   :  { %375 = vst.msk [vmem:[#allocation2 + $0x20] sm:$0xff] %vm285_vm2, %v367_v14  ;;  %v368_v17 = vmax.f32 %v352_v15, 0.0 }
 0x2ac   :  { %378 = vst.msk [vmem:[#allocation2 + $0x38] sm:$0xff] %vm285_vm2, %v370_v16  ;;  %v382_v18 = vpack.c.bf16 %v370_v16, %v369_v11  ;;  %1305 = vmatpush3.bf16.msra.mxu0 %v380_v4  ;;  %v1411_v16 = vld [vmem:[%s1655_s2 + $0x38] sm:$0xff]  }
 0x2ad   :  { %376 = vst.msk [vmem:[#allocation2 + $0x28] sm:$0xff] %vm285_vm2, %v368_v17  ;;  %v381_v19 = vpack.c.bf16 %v368_v17, %v367_v14 }
 0x2af   :  { %1306 = vmatprep.subr.bf16.mxu0 %v381_v19 }
 0x2b0   :  { %1307 = vmatpush3.bf16.msra.mxu0 %v381_v19 }
 0x2b1   :  { %1308 = vmatprep.subr.bf16.mxu0 %v382_v18 }
 0x2b4   :  { %1309 = vmatpush3.bf16.msra.mxu0 %v382_v18  ;;  %v1412_v18 = vld [vmem:[%s1655_s2 + $0x40] sm:$0xff]  }
 0x2b5   :  { %1330 = vmatprep.subr.bf16.mxu0 %v1405_v23 }
 0x2b7   :  { %1311 = vmatmul.mubr.msk.bf16.vlgmr.msra.gmra.mrb[8].mxu0 %vm87_vm0, %v1400_v20 }
 0x2b8   :  { %1314 = vmatprep.mubr.msk.bf16.mxu0 %vm87_vm0, %v1401_v21  ;;  %1331 = vmatpush3.bf16.msra.mxu0 %v1405_v23 }
 0x2b9   :  { %1332 = vmatprep.subr.bf16.mxu0 %v1406_v36 }
 0x2bc   :  { %1333 = vmatpush3.bf16.msra.mxu0 %v1406_v36  ;;  %v1410_v36 = vld [vmem:[%s1653_s0 + $0x18] sm:$0xff]  }
 0x2bd   :  { %1358 = vmatprep.subr.bf16.mxu0 %v1411_v16 }
 0x2bf   :  { %1315 = vmatmul.mubr.msk.bf16.gmra.mrb[12].mxu0 %vm87_vm0, %v1402_v22 }
 0x38a   :  { %v1312_v24 = vpop.f32.mrb[8].mxu0 }
 0x38b   :  { %v467_v25 = vpop.f32.mrb[9].mxu0 }
 0x38c   :  { %v1313_v26 = vpop.f32.mrb[10].mxu0 }
 0x38d   :  { %v499_v27 = vpack.c.bf16 %v1313_v26, %v1312_v24  ;;  %v470_v28 = vpop.f32.mrb[11].mxu0 }
 0x38e   :  { %v498_v29 = vpack.c.bf16 %v470_v28, %v467_v25 }
 0x390   :  { %1322 = vmatprep.mubr.msk.bf16.mxu1 %vm285_vm2, %v498_v29 }
 0x391   :  { %1323 = vmatmul.mubr.msk.bf16.vlgmr.msra.gmra.mrb[16].mxu1 %vm285_vm2, %v499_v27 }
 0x392   :  { %v1316_v30 = vpop.f32.mrb[12].mxu0 }
 0x393   :  { %v483_v31 = vpop.f32.mrb[13].mxu0 }
 0x394   :  { %v1317_v32 = vpop.f32.mrb[14].mxu0 }
 0x395   :  { %v501_v33 = vpack.c.bf16 %v1317_v32, %v1316_v30  ;;  %v486_v34 = vpop.f32.mrb[15].mxu0 }
 0x396   :  { %v500_v35 = vpack.c.bf16 %v486_v34, %v483_v31  ;;  %v1408_v34 = vld [vmem:[%s1653_s0 + $0x8] sm:$0xff]  }
 0x398   :  { %1326 = vmatprep.mubr.msk.bf16.mxu1 %vm285_vm2, %v500_v35  ;;  %v1409_v35 = vld [vmem:[%s1653_s0 + $0x10] sm:$0xff]  }
 0x399   :  { %1327 = vmatmul.mubr.msk.bf16.gmra.mrb[20].mxu1 %vm285_vm2, %v501_v33 }
 0x39a   :  { %1350 = vmatprep.mubr.msk.bf16.mxu1 %vm87_vm0, %v1407_v2 }
 0x464   :  { %v1324_v38 = vpop.f32.mrb[16].mxu1 }
 0x465   :  { %v573_v39 = vadd.f32 %v1324_v38, %v1169_v37  ;;  %v564_v40 = vpop.f32.mrb[17].mxu1 }
 0x466   :  { %v565_v41 = vadd.f32 %v1169_v37, %v564_v40  ;;  %v1325_v42 = vpop.f32.mrb[18].mxu1 }
 0x467   :  { %v576_v43 = vadd.f32 %v1325_v42, %v1169_v37  ;;  %v567_v44 = vpop.f32.mrb[19].mxu1  ;;  %v597_v46 = vmax.f32 %v573_v39, 0.0 }
 0x468   :  { %v568_v45 = vadd.f32 %v1169_v37, %v567_v44  ;;  %v595_v48 = vmax.f32 %v565_v41, 0.0  ;;  %v1413_v41 = vld [vmem:[%s1655_s2 + $0x48] sm:$0xff]  }
 0x469   :  { %v598_v47 = vmax.f32 %v576_v43, 0.0 }
 0x46a   :  { %v596_v49 = vmax.f32 %v568_v45, 0.0 }
 0x46b   :  { %v604_v50 = vpack.c.bf16 %v598_v47, %v597_v46 }
 0x46c   :  { %v603_v51 = vpack.c.bf16 %v596_v49, %v595_v48  ;;  %v1328_v52 = vpop.f32.mrb[20].mxu1 }
 0x46d   :  { %v589_v53 = vadd.f32 %v1328_v52, %v1169_v37  ;;  %v580_v54 = vpop.f32.mrb[21].mxu1 }
 0x46e   :  { %v581_v55 = vadd.f32 %v1169_v37, %v580_v54  ;;  %v1329_v56 = vpop.f32.mrb[22].mxu1  ;;  %1334 = vmatprep.mubr.msk.bf16.mxu0 %vm285_vm2, %v603_v51 }
 0x46f   :  { %v592_v57 = vadd.f32 %v1329_v56, %v1169_v37  ;;  %v583_v58 = vpop.f32.mrb[23].mxu1  ;;  %1335 = vmatmul.mubr.msk.bf16.vlgmr.msra.gmra.mrb[16].mxu0 %vm285_vm2, %v604_v50  ;;  %v601_v60 = vmax.f32 %v589_v53, 0.0 }
 0x470   :  { %v584_v59 = vadd.f32 %v1169_v37, %v583_v58  ;;  %v599_v62 = vmax.f32 %v581_v55, 0.0  ;;  %1359 = vmatpush3.bf16.msra.mxu0 %v1411_v16  ;;  %v1414_v58 = vld [vmem:[%s1655_s2 + $0x50] sm:$0xff]  }
 0x471   :  { %v602_v61 = vmax.f32 %v592_v57, 0.0  ;;  %1360 = vmatprep.subr.bf16.mxu0 %v1412_v18 }
 0x472   :  { %v600_v63 = vmax.f32 %v584_v59, 0.0  ;;  %v1191_v59 = vld [vmem:[%s1656_s3 + $0x4] ss:$0 sm:$0xff] }
 0x473   :  { %v606_v0 = vpack.c.bf16 %v602_v61, %v601_v60 }
 0x474   :  { %v605_v1 = vpack.c.bf16 %v600_v63, %v599_v62  ;;  %1361 = vmatpush3.bf16.msra.mxu0 %v1412_v18 }
 0x476   :  { %1338 = vmatprep.mubr.msk.bf16.mxu0 %vm285_vm2, %v605_v1 }
 0x477   :  { %1339 = vmatmul.mubr.msk.bf16.gmra.mrb[20].mxu0 %vm285_vm2, %v606_v0 }
 0x542   :  { %v1336_v4 = vpop.f32.mrb[16].mxu0 }
 0x543   :  { %v678_v5 = vadd.f32 %v1336_v4, %v1176_v3  ;;  %v669_v6 = vpop.f32.mrb[17].mxu0 }
 0x544   :  { %v670_v7 = vadd.f32 %v1176_v3, %v669_v6  ;;  %v1337_v8 = vpop.f32.mrb[18].mxu0 }
 0x545   :  { %v702_v9 = vmax.f32 %v678_v5, 0.0  ;;  %v681_v10 = vadd.f32 %v1337_v8, %v1176_v3  ;;  %v672_v11 = vpop.f32.mrb[19].mxu0 }
 0x546   :  { %v700_v12 = vmax.f32 %v670_v7, 0.0  ;;  %v673_v13 = vadd.f32 %v1176_v3, %v672_v11 }
 0x547   :  { %v703_v14 = vmax.f32 %v681_v10, 0.0  ;;  %720 = vrot.lane.b32.xlu1 %v702_v9, %s1439_s9 }
 0x548   :  { %v701_v15 = vmax.f32 %v673_v13, 0.0  ;;  %716 = vrot.lane.b32.xlu0 %v700_v12, %s1439_s9 }
 0x549   :  { %v750_v17 = vpack.c.bf16 %v703_v14, %v702_v9 }
 0x54a   :  { %v749_v19 = vpack.c.bf16 %v701_v15, %v700_v12  ;;  %v1340_v20 = vpop.f32.mrb[20].mxu0 }
 0x54b   :  { %v694_v21 = vadd.f32 %v1340_v20, %v1176_v3  ;;  %722 = vrot.lane.b32.xlu1 %v703_v14, %s1439_s9  ;;  %v685_v22 = vpop.f32.mrb[21].mxu0 }
 0x54c   :  { %v686_v23 = vadd.f32 %v1176_v3, %v685_v22  ;;  %718 = vrot.lane.b32.xlu0 %v701_v15, %s1439_s9  ;;  %v1341_v24 = vpop.f32.mrb[22].mxu0  ;;  %1342 = vmatprep.subr.bf16.mxu1 %v749_v19 }
 0x54d   :  { %v706_v25 = vmax.f32 %v694_v21, 0.0  ;;  %v697_v26 = vadd.f32 %v1341_v24, %v1176_v3  ;;  %v688_v27 = vpop.f32.mrb[23].mxu0  ;;  %1343 = vmatpush3.bf16.msra.mxu1 %v749_v19  ;;  %v1198_v24 = vld [vmem:[%s1656_s3 + $0x5] ss:$0 sm:$0xff]  ;;  %s1442_s3 = smov [#allocation2]  }
 0x54e   :  { %v689_v28 = vadd.f32 %v1176_v3, %v688_v27  ;;  %1344 = vmatprep.subr.bf16.mxu1 %v750_v17  ;;  %v704_v30 = vmax.f32 %v686_v23, 0.0  ;;  %s1125_s27 = sshll.u32 %s1442_s3, 4  ;;  %s1126_s27 = int_to_ptr.vmem [resolvable:$true] %s1125_s27 }
 0x54f   :  { %v707_v29 = vmax.f32 %v697_v26, 0.0  ;;  %s1415_s28 = scalar_lea.vmem %s1126_s27, 1024  ;;  %p1420_p1 = scmp.lt.s32.totalorder %s1126_s27, %s1126_s27 }
 0x550   :  { %v705_v31 = vmax.f32 %v689_v28, 0.0  ;;  %728 = vrot.lane.b32.xlu0 %v706_v25, %s1439_s9  ;;  %p1416_p0 = scmp.ne.s32.totalorder %s1126_s27, %s1415_s28  ;;  %p1421_p2 = scmp.lt.s32.totalorder %s1415_s28, %s1415_s28 }
 0x551   :  { %v752_v32 = vpack.c.bf16 %v707_v29, %v706_v25  ;;  %1345 = vmatpush3.bf16.msra.mxu1 %v750_v17  ;;  %730 = vrot.lane.b32.xlu1 %v707_v29, %s1439_s9 }
 0x552   :  { %v751_v33 = vpack.c.bf16 %v705_v31, %v704_v30  ;;  %p1422_p3 = por %p1421_p2, %p1420_p1 }
 0x554   :  { %724 = vrot.lane.b32.xlu0 %v704_v30, %s1439_s9  ;;  %1346 = vmatprep.subr.bf16.mxu1 %v751_v33  ;;  %p1423_p4 = pnand %p1422_p3, %p1416_p0 }
 0x555   :  { %726 = vrot.lane.b32.xlu1 %v705_v31, %s1439_s9  ;;  %1347 = vmatpush3.bf16.msra.mxu1 %v751_v33 }
 0x556   :  { %1348 = vmatprep.subr.bf16.mxu1 %v752_v32 }
 0x559   :  { %1349 = vmatpush3.bf16.msra.mxu1 %v752_v32 }
 0x55a   :  { %1370 = vmatprep.subr.bf16.mxu1 %v1413_v41 }
 0x55c   :  { %1351 = vmatmul.mubr.msk.bf16.vlgmr.msra.gmra.mrb[24].mxu1 %vm87_vm0, %v1408_v34 }
 0x55d   :  { %1354 = vmatprep.mubr.msk.bf16.mxu1 %vm87_vm0, %v1409_v35  ;;  %1371 = vmatpush3.bf16.msra.mxu1 %v1413_v41 }
 0x55e   :  { %1372 = vmatprep.subr.bf16.mxu1 %v1414_v58 }
 0x561   :  { %1373 = vmatpush3.bf16.msra.mxu1 %v1414_v58 }
 0x564   :  { %1355 = vmatmul.mubr.msk.bf16.gmra.mrb[28].mxu1 %vm87_vm0, %v1410_v36 }
 0x5b9   :  { %v721_v37 = vpop.permute.xlu1 %720 }
 0x5ba   :  { %743 = vst.msk [vmem:[#allocation2 + $0x10] sm:$0xff] %vm740_vm3, %v721_v37  ;;  %v717_v38 = vpop.permute.xlu0 %716 }
 0x5bb   :  { %741 = vst.msk [vmem:[#allocation2] sm:$0xff] %vm740_vm3, %v717_v38 }
 0x5bd   :  { %v723_v39 = vpop.permute.xlu1 %722 }
 0x5be   :  { %744 = vst.msk [vmem:[#allocation2 + $0x18] sm:$0xff] %vm740_vm3, %v723_v39  ;;  %v719_v40 = vpop.permute.xlu0 %718 }
 0x5bf   :  { %742 = vst.msk [vmem:[#allocation2 + $0x8] sm:$0xff] %vm740_vm3, %v719_v40 }
 0x5c2   :  { %v729_v42 = vpop.permute.xlu0 %728 }
 0x5c3   :  { %747 = vst.msk [vmem:[#allocation2 + $0x30] sm:$0xff] %vm740_vm3, %v729_v42  ;;  %v731_v43 = vpop.permute.xlu1 %730  ;;  %v1441_v42 = vmov 0.0  }
 0x5c4   :  { %748 = vst.msk [vmem:[#allocation2 + $0x38] sm:$0xff] %vm740_vm3, %v731_v43 }
 0x5c6   :  { %v725_v44 = vpop.permute.xlu0 %724 }
 0x5c7   :  { %745 = vst.msk [vmem:[#allocation2 + $0x20] sm:$0xff] %vm740_vm3, %v725_v44  ;;  %v727_v45 = vpop.permute.xlu1 %726 }
 0x5c8   :  { %746 = vst.msk [vmem:[#allocation2 + $0x28] sm:$0xff] %vm740_vm3, %v727_v45 }
 0x62f   :  { %v1352_v46 = vpop.f32.mrb[24].mxu1 }
 0x630   :  { %v837_v47 = vpop.f32.mrb[25].mxu1 }
 0x631   :  { %v1353_v48 = vpop.f32.mrb[26].mxu1 }
 0x632   :  { %v869_v49 = vpack.c.bf16 %v1353_v48, %v1352_v46  ;;  %v840_v50 = vpop.f32.mrb[27].mxu1 }
 0x633   :  { %v868_v51 = vpack.c.bf16 %v840_v50, %v837_v47 }
 0x635   :  { %1362 = vmatprep.mubr.msk.bf16.mxu0 %vm285_vm2, %v868_v51 }
 0x636   :  { %1363 = vmatmul.mubr.msk.bf16.vlgmr.msra.gmra.mrb[24].mxu0 %vm285_vm2, %v869_v49 }
 0x637   :  { %v1356_v52 = vpop.f32.mrb[28].mxu1 }
 0x638   :  { %v853_v53 = vpop.f32.mrb[29].mxu1 }
 0x639   :  { %v1357_v54 = vpop.f32.mrb[30].mxu1 }
 0x63a   :  { %v871_v55 = vpack.c.bf16 %v1357_v54, %v1356_v52  ;;  %v856_v56 = vpop.f32.mrb[31].mxu1 }
 0x63b   :  { %v870_v57 = vpack.c.bf16 %v856_v56, %v853_v53 }
 0x63d   :  { %1366 = vmatprep.mubr.msk.bf16.mxu0 %vm285_vm2, %v870_v57 }
 0x63e   :  { %1367 = vmatmul.mubr.msk.bf16.gmra.mrb[28].mxu0 %vm285_vm2, %v871_v55 }
 0x709   :  { %v1364_v60 = vpop.f32.mrb[24].mxu0 }
 0x70a   :  { %v943_v61 = vadd.f32 %v1364_v60, %v1191_v59  ;;  %v934_v62 = vpop.f32.mrb[25].mxu0 }
 0x70b   :  { %v935_v63 = vadd.f32 %v1191_v59, %v934_v62  ;;  %v1365_v0 = vpop.f32.mrb[26].mxu0 }
 0x70c   :  { %v946_v1 = vadd.f32 %v1365_v0, %v1191_v59  ;;  %v937_v2 = vpop.f32.mrb[27].mxu0  ;;  %v967_v4 = vmax.f32 %v943_v61, 0.0 }
 0x70d   :  { %v938_v3 = vadd.f32 %v1191_v59, %v937_v2  ;;  %v965_v6 = vmax.f32 %v935_v63, 0.0 }
 0x70e   :  { %v968_v5 = vmax.f32 %v946_v1, 0.0 }
 0x70f   :  { %v966_v7 = vmax.f32 %v938_v3, 0.0 }
 0x710   :  { %v974_v8 = vpack.c.bf16 %v968_v5, %v967_v4 }
 0x711   :  { %v973_v9 = vpack.c.bf16 %v966_v7, %v965_v6  ;;  %v1368_v10 = vpop.f32.mrb[28].mxu0 }
 0x712   :  { %v959_v11 = vadd.f32 %v1368_v10, %v1191_v59  ;;  %v950_v12 = vpop.f32.mrb[29].mxu0 }
 0x713   :  { %v951_v13 = vadd.f32 %v1191_v59, %v950_v12  ;;  %v1369_v14 = vpop.f32.mrb[30].mxu0  ;;  %1374 = vmatprep.mubr.msk.bf16.mxu1 %vm285_vm2, %v973_v9 }
 0x714   :  { %v962_v15 = vadd.f32 %v1369_v14, %v1191_v59  ;;  %v953_v16 = vpop.f32.mrb[31].mxu0  ;;  %1375 = vmatmul.mubr.msk.bf16.vlgmr.msra.gmra.mrb[32].mxu1 %vm285_vm2, %v974_v8  ;;  %v971_v18 = vmax.f32 %v959_v11, 0.0 }
 0x715   :  { %v954_v17 = vadd.f32 %v1191_v59, %v953_v16  ;;  %v969_v20 = vmax.f32 %v951_v13, 0.0 }
 0x716   :  { %v972_v19 = vmax.f32 %v962_v15, 0.0 }
 0x717   :  { %v970_v21 = vmax.f32 %v954_v17, 0.0 }
 0x718   :  { %v976_v22 = vpack.c.bf16 %v972_v19, %v971_v18 }
 0x719   :  { %v975_v23 = vpack.c.bf16 %v970_v21, %v969_v20 }
 0x71b   :  { %1378 = vmatprep.mubr.msk.bf16.mxu1 %vm285_vm2, %v975_v23 }
 0x71c   :  { %1379 = vmatmul.mubr.msk.bf16.gmra.mrb[36].mxu1 %vm285_vm2, %v976_v22 }
 0x7e7   :  { %v1376_v25 = vpop.f32.mrb[32].mxu1 }
 0x7e8   :  { %v1048_v26 = vadd.f32 %v1376_v25, %v1198_v24  ;;  %v1039_v27 = vpop.f32.mrb[33].mxu1 }
 0x7e9   :  { %v1377_v28 = vpop.f32.mrb[34].mxu1  ;;  %v1040_v31 = vadd.f32 %v1198_v24, %v1039_v27 }
 0x7ea   :  { %v1051_v29 = vadd.f32 %v1377_v28, %v1198_v24  ;;  %1082 = vrot.lane.b32.xlu0 %v1048_v26, %s1440_s26  ;;  %v1042_v30 = vpop.f32.mrb[35].mxu1 }
 0x7eb   :  { %v1043_v32 = vadd.f32 %v1198_v24, %v1042_v30 }
 0x7ec   :  { %1084 = vrot.lane.b32.xlu1 %v1051_v29, %s1440_s26 }
 0x7ee   :  { %1078 = vrot.lane.b32.xlu0 %v1040_v31, %s1440_s26 }
 0x7ef   :  { %v1380_v33 = vpop.f32.mrb[36].mxu1 }
 0x7f0   :  { %1080 = vrot.lane.b32.xlu1 %v1043_v32, %s1440_s26  ;;  %v1055_v34 = vpop.f32.mrb[37].mxu1  ;;  %v1064_v39 = vadd.f32 %v1380_v33, %v1198_v24 }
 0x7f1   :  { %v1056_v35 = vadd.f32 %v1198_v24, %v1055_v34  ;;  %v1381_v36 = vpop.f32.mrb[38].mxu1 }
 0x7f2   :  { %v1058_v37 = vpop.f32.mrb[39].mxu1  ;;  %v1067_v40 = vadd.f32 %v1381_v36, %v1198_v24 }
 0x7f3   :  { %v1059_v38 = vadd.f32 %v1198_v24, %v1058_v37  ;;  %1086 = vrot.lane.b32.xlu0 %v1056_v35, %s1440_s26 }
 0x7f5   :  { %1088 = vrot.lane.b32.xlu1 %v1059_v38, %s1440_s26 }
 0x7f7   :  { %1090 = vrot.lane.b32.xlu0 %v1064_v39, %s1440_s26 }
 0x7f9   :  { %1092 = vrot.lane.b32.xlu1 %v1067_v40, %s1440_s26 }
 0x85c   :  { %v1083_v41 = vpop.permute.xlu0 %1082 }
 0x85d   :  { %1105 = vst.msk [vmem:[#allocation2 + $0x10] sm:$0xff] %vm1102_vm4, %v1083_v41 }
 0x85e   :  { %1114 = vst.msk [vmem:[#allocation2 + $0x10] sm:$0xff] %vm1111_vm5, %v1441_v42  ;;  %v1085_v43 = vpop.permute.xlu1 %1084 }
 0x85f   :  { %1106 = vst.msk [vmem:[#allocation2 + $0x18] sm:$0xff] %vm1102_vm4, %v1085_v43 }
 0x860   :  { %1115 = vst.msk [vmem:[#allocation2 + $0x18] sm:$0xff] %vm1111_vm5, %v1441_v42  ;;  %v1079_v44 = vpop.permute.xlu0 %1078 }
 0x861   :  { %1103 = vst.msk [vmem:[#allocation2] sm:$0xff] %vm1102_vm4, %v1079_v44 }
 0x862   :  { %1112 = vst.msk [vmem:[#allocation2] sm:$0xff] %vm1111_vm5, %v1441_v42  ;;  %v1081_v45 = vpop.permute.xlu1 %1080 }
 0x863   :  { %1104 = vst.msk [vmem:[#allocation2 + $0x8] sm:$0xff] %vm1102_vm4, %v1081_v45 }
 0x864   :  { %1113 = vst.msk [vmem:[#allocation2 + $0x8] sm:$0xff] %vm1111_vm5, %v1441_v42 }
 0x865   :  { %v1087_v46 = vpop.permute.xlu0 %1086 }
 0x866   :  { %1107 = vst.msk [vmem:[#allocation2 + $0x20] sm:$0xff] %vm1102_vm4, %v1087_v46 }
 0x867   :  { %1116 = vst.msk [vmem:[#allocation2 + $0x20] sm:$0xff] %vm1111_vm5, %v1441_v42  ;;  %v1089_v47 = vpop.permute.xlu1 %1088 }
 0x868   :  { %1108 = vst.msk [vmem:[#allocation2 + $0x28] sm:$0xff] %vm1102_vm4, %v1089_v47 }
 0x869   :  { %1117 = vst.msk [vmem:[#allocation2 + $0x28] sm:$0xff] %vm1111_vm5, %v1441_v42  ;;  %v1091_v48 = vpop.permute.xlu0 %1090 }
 0x86a   :  { %1109 = vst.msk [vmem:[#allocation2 + $0x30] sm:$0xff] %vm1102_vm4, %v1091_v48 }
 0x86b   :  { %1118 = vst.msk [vmem:[#allocation2 + $0x30] sm:$0xff] %vm1111_vm5, %v1441_v42  ;;  %v1093_v49 = vpop.permute.xlu1 %1092 }
 0x86c   :  { %1110 = vst.msk [vmem:[#allocation2 + $0x38] sm:$0xff] %vm1102_vm4, %v1093_v49 }
 0x86d   :  { %1119 = vst.msk [vmem:[#allocation2 + $0x38] sm:$0xff] %vm1111_vm5, %v1441_v42 }
 0x86e   :  { %1426 = shalt.err (!%p1423_p4)
}
 0x86f   :  { %s1427_s1 = scalar_lea.hbm %s1657_s4, 1024 }
 0x870   :  { %p1428_p5 = scmp.ne.s32.totalorder %s1657_s4, %s1427_s1  ;;  %p1431_p6 = scmp.lt.u32.totalorder %s1427_s1, %s1657_s4 }
 0x872   :  { %p1433_p7 = pnand %p1431_p6, %p1428_p5 }
 0x874   :  { %1436 = shalt.err (!%p1433_p7)
}
 0x875   :  { %s1443_s9 = smov 128   ;;  %s1444_s10 = smov 8  }
 0x876   :  { %1131 = dma.vmem_to_hbm [thread:$0]  %s1126_s27, 1024, %s1657_s4, [#allocation3], %s1443_s9, %s1443_s9, %s1444_s10  }
 0x877   :  { %1437 = dma.done.wait [#allocation3], 1024  }
 0x878   :  { %1438 = vsyncadd [#allocation3], 4294966272 }
 0x879   :  { %1135 = vsyncpa [#allocation3], 1 }

</bundles_post_ra>
